<compile_context>
chip_gen: v7x
topology: tpu7x:2x2x1
jax: 0.10.0
libtpu: 0.0.40
codegen_flags: <defaults>
</compile_context>

<pallas_src>
import functools

import numpy as np
import jax
import jax.numpy as jnp
from jax.experimental import pallas as pl
from jax.experimental.pallas import tpu as pltpu


# ----------------------------------------------------------------------------
# Host-side parameter construction (mirrors the PyTorch module __init__).
# ----------------------------------------------------------------------------
def make_extended_grid(in_dim, num, k, grid_range=(-1.0, 1.0)):
    grid = jnp.linspace(grid_range[0], grid_range[1], num + 1, dtype=jnp.float32)
    grid = jnp.broadcast_to(grid[None, :], (in_dim, num + 1))
    h = (grid[:, -1:] - grid[:, :1]) / (grid.shape[1] - 1)
    for _ in range(k):
        grid = jnp.concatenate([grid[:, :1] - h, grid], axis=1)
        grid = jnp.concatenate([grid, grid[:, -1:] + h], axis=1)
    return grid  # [in_dim, num + 2k + 1]


def b_batch_ref(x, grid, k):
    """Pure-JAX transcription of the PyTorch B_batch (reference / init only)."""
    x3 = x[:, :, None]
    g3 = grid[None, :, :]
    G = grid.shape[-1]
    val = ((x3 >= g3[:, :, : G - 1]) & (x3 < g3[:, :, 1:G])).astype(jnp.float32)
    val = jnp.nan_to_num(val)
    for kk in range(1, k + 1):
        val = (x3 - g3[:, :, : G - (kk + 1)]) / (g3[:, :, kk: G - 1] - g3[:, :, : G - (kk + 1)]) * val[:, :, :-1] \
            + (g3[:, :, kk + 1: G] - x3) / (g3[:, :, kk + 1: G] - g3[:, :, 1: G - kk]) * val[:, :, 1:]
        val = jnp.nan_to_num(val)
    return val


def curve2coef(x_eval, y_eval, grid, k, lamb=1e-8):
    """Regularized least-squares spline fit (host-side init, plain JAX)."""
    batch, in_dim = x_eval.shape
    out_dim = y_eval.shape[2]
    n_coef = grid.shape[1] - k - 1
    mat = b_batch_ref(x_eval, grid, k)                                   # [batch, in, n_coef]
    mat = jnp.broadcast_to(jnp.transpose(mat, (1, 0, 2))[:, None],
                           (in_dim, out_dim, batch, n_coef))
    y = jnp.transpose(y_eval, (1, 2, 0))[..., None]                      # [in, out, batch, 1]
    matT = jnp.swapaxes(mat, -1, -2)
    XtX = jnp.einsum('ijmn,ijnp->ijmp', matT, mat)
    Xty = jnp.einsum('ijmn,ijnp->ijmp', matT, y)
    A = XtX + lamb * jnp.eye(n_coef, dtype=XtX.dtype)
    coef = (jnp.linalg.pinv(A) @ Xty)[..., 0]                            # [in, out, n_coef]
    return coef


def init_spline_kan(key, layers, num=5, k=3, noise_scale=0.5, grid_range=(-1.0, 1.0)):
    # TODO(synk): parameter init (curve2coef / pinverse) is host-side JAX, not a Pallas kernel.
    params = []
    for li in range(len(layers) - 1):
        in_dim, out_dim = layers[li], layers[li + 1]
        grid = make_extended_grid(in_dim, num, k, grid_range)
        key, sub = jax.random.split(key)
        noises = (jax.random.uniform(sub, (num + 1, in_dim, out_dim), jnp.float32) - 0.5) \
                 * noise_scale / num
        coef = curve2coef(jnp.transpose(grid[:, k:-k]), noises, grid, k)
        scale_sp = jnp.ones((in_dim, out_dim), jnp.float32)
        params.append(dict(grid=grid, coef=coef, scale_sp=scale_sp, k=k))
    return params


# ----------------------------------------------------------------------------
# Compile-time scalar constants extracted from the (uniform) extended grid.
# ----------------------------------------------------------------------------
def _layer_constants(grid, k):
    g = np.asarray(grid, dtype=np.float64)
    row = g[0]
    # The module builds the extended grid as the same linspace for every in_dim
    # row, so knots/denominators are compile-time scalars shared across in_dim.
    assert np.allclose(g, row[None, :]), "grid rows must be identical (uniform KAN grid)"
    G = row.shape[0]
    knots = tuple(float(v) for v in row)
    rl, rr = [], []
    for kk in range(1, k + 1):
        nj = G - 1 - kk
        dl = row[kk:kk + nj] - row[:nj]
        dr = row[kk + 1:kk + 1 + nj] - row[1:1 + nj]
        # Reference relies on nan_to_num only for 0/0; for the strictly increasing
        # uniform extended grid all denominators are nonzero (asserted here).
        assert np.all(dl != 0.0) and np.all(dr != 0.0), "repeated knots are unsupported"
        rl.append(tuple(float(1.0 / v) for v in dl))
        rr.append(tuple(float(1.0 / v) for v in dr))
    return knots, tuple(rl), tuple(rr)


# ----------------------------------------------------------------------------
# Fused whole-network kernel: per layer, Cox–de Boor basis (scalar-immediate
# knots / reciprocals) + one MXU dot against the fused scale_sp*coef weight.
# ----------------------------------------------------------------------------
def _kan_net_kernel(*refs, layer_consts):
    # refs = (x_ref, w_ref_0, ..., w_ref_{L-1}, out_ref)
    # x_ref   : [in_dim0, tile]                 activations, batch on lanes
    # w_ref_l : [out_dim_l, in_dim_l * nbasis]  fused scale_sp*coef weights (lane-dense)
    # out_ref : [out_dim_last, tile]
    x_ref, out_ref = refs[0], refs[-1]
    w_refs = refs[1:-1]
    x = x_ref[...].astype(jnp.float32)

    for w_ref, (k, knots, rl, rr) in zip(w_refs, layer_consts):
        G = len(knots)
        # Order 0: half-open interval indicator (x >= g_j) & (x < g_{j+1});
        # knots are scalar immediates -> pure VPU compares, no VMEM constant loads.
        basis = [((x >= knots[j]) & (x < knots[j + 1])).astype(jnp.float32)
                 for j in range(G - 1)]
        # Cox–de Boor orders 1..k with pre-inverted scalar denominators.
        for kk in range(1, k + 1):
            basis = [(x - knots[j]) * rl[kk - 1][j] * basis[j]
                     + (knots[j + kk + 1] - x) * rr[kk - 1][j] * basis[j + 1]
                     for j in range(G - 1 - kk)]
        # len(basis) == nbasis = G - 1 - k
        # Stack to [nbasis * in_dim, tile] and contract on the MXU:
        #   y[o, b] = sum_{j,i} w[o, j*in_dim + i] * basis_j[i, b]
        stack = jnp.concatenate(basis, axis=0)
        # TODO(synk): for realistic KAN widths, cast stack/w to bf16 here (keep f32 accum).
        x = jnp.dot(w_ref[...], stack, preferred_element_type=jnp.float32)

    out_ref[...] = x.astype(out_ref.dtype)


def _spline_kan_net_tpu(xT, params, tile):
    """Fused SplineKAN forward: xT [in_dim0, Bp] -> [out_dim_last, Bp] (batch on lanes)."""
    D0, Bp = xT.shape
    assert Bp % tile == 0 and tile % 128 == 0

    weights, consts = [], []
    in_specs = [pl.BlockSpec((D0, tile), lambda i: (0, i))]            # activations
    for p in params:
        coef, scale_sp, k = p["coef"], p["scale_sp"], p["k"]
        in_dim, out_dim, nbasis = coef.shape
        consts.append((k,) + _layer_constants(p["grid"], k))
        # w2d[o, j*in_dim + i] = scale_sp[i, o] * coef[i, o, j]   (lane-dense 2-D)
        w2d = (jnp.transpose(scale_sp)[:, None, :] *
               jnp.transpose(coef, (1, 2, 0))).reshape(out_dim, nbasis * in_dim)
        weights.append(w2d.astype(jnp.float32))
        in_specs.append(pl.BlockSpec(w2d.shape, lambda i: (0, 0)))     # resident weight

    out_dim_last = params[-1]["coef"].shape[1]
    return pl.pallas_call(
        functools.partial(_kan_net_kernel, layer_consts=tuple(consts)),
        out_shape=jax.ShapeDtypeStruct((out_dim_last, Bp), jnp.float32),
        grid_spec=pl.GridSpec(
            grid=(Bp // tile,),
            in_specs=in_specs,
            out_specs=pl.BlockSpec((out_dim_last, tile), lambda i: (0, i)),
        ),
        compiler_params=pltpu.CompilerParams(dimension_semantics=("parallel",)),
    )(xT, *weights)


# ----------------------------------------------------------------------------
# Full forward wrapper (batch on the lane axis, lane-dense padding).
# ----------------------------------------------------------------------------
def _choose_batch_tile(B, max_tile=512):
    assert max_tile % 128 == 0
    Bp = ((B + 127) // 128) * 128                 # lane-dense padding
    tile = min(max_tile, Bp)                      # cap tile -> bounded vreg pressure
    Bp = ((Bp + tile - 1) // tile) * tile         # few grid steps (1-2) at small batch
    return tile, Bp


def build_spline_kan_forward(params, *, max_tile=512):
    def forward(x):
        B = x.shape[0]
        tile, Bp = _choose_batch_tile(B, max_tile)
        xT = jnp.transpose(x.astype(jnp.float32))          # [in_dim, B]
        xT = jnp.pad(xT, ((0, 0), (0, Bp - B)))
        yT = _spline_kan_net_tpu(xT, params, tile)
        return jnp.transpose(yT[:, :B])                    # [B, out_dim]
    return jax.jit(forward)


# ----------------------------------------------------------------------------
# Pure-JAX reference of the full module forward (for the correctness check).
# ----------------------------------------------------------------------------
def spline_kan_ref(x, params):
    for p in params:
        basis = b_batch_ref(x, p["grid"], p["k"])           # [B, in, nbasis]
        y_eval = jnp.einsum('bik,iok->bio', basis, p["coef"])
        x = jnp.sum(p["scale_sp"][None, :, :] * y_eval, axis=1)
    return x


if __name__ == "__main__":
    layers = (3, 4, 2)   # SplineKAN(layers, degree=degree)
    degree = 3           # spline order k
    num = 5              # SplineKANLayer default
    batch = 300          # not a tile multiple -> exercises lane padding + 2 grid steps

    key = jax.random.PRNGKey(0)
    kx, kp = jax.random.split(key)
    x = jax.random.uniform(kx, (batch, layers[0]), jnp.float32, minval=-1.0, maxval=1.0)

    params = init_spline_kan(kp, layers, num=num, k=degree)

    forward = build_spline_kan_forward(params, max_tile=256)
    y = jax.block_until_ready(forward(x))

    ref = spline_kan_ref(x, params)
    assert y.shape == (batch, layers[-1]), y.shape
    max_err = float(jnp.max(jnp.abs(y - ref)))
    # MXU f32 matmul may run at reduced internal precision; tolerance reflects that.
    assert max_err < 5e-3, max_err
    assert jnp.allclose(y, ref, atol=5e-3, rtol=5e-2), max_err

    print("KERNEL_OK")
</pallas_src>

<mosaic_0001>
module attributes {stable_mosaic.version = 11 : i64} {
  func.func @_kan_net_kernel(%arg0: i32, %arg1: memref<3x256xf32, #tpu.memory_space<vmem>>, %arg2: memref<4x24xf32, #tpu.memory_space<vmem>>, %arg3: memref<2x32xf32, #tpu.memory_space<vmem>>, %arg4: memref<2x256xf32, #tpu.memory_space<vmem>>) attributes {dimension_semantics = [#tpu.dimension_semantics<parallel>], iteration_bounds = array<i64: 2>, scalar_prefetch = 0 : i64, scratch_operands = 0 : i64, tpu.core_type = #tpu.core_type<tc>, window_params = [{transform_indices = @transform_0, window_bounds = array<i64: 3, 256>}, {pipeline_mode = #tpu.pipeline_mode<synchronous>, transform_indices = @transform_1, window_bounds = array<i64: 4, 24>}, {pipeline_mode = #tpu.pipeline_mode<synchronous>, transform_indices = @transform_2, window_bounds = array<i64: 2, 32>}, {transform_indices = @transform_3, window_bounds = array<i64: 2, 256>}]} {
    %c0 = arith.constant 0 : index
    %c0_0 = arith.constant 0 : index
    %0 = vector.load %arg1[%c0, %c0_0] : memref<3x256xf32, #tpu.memory_space<vmem>>, vector<3x256xf32>
    %cst = arith.constant -2.200000e+00 : f32
    %1 = vector.broadcast %cst : f32 to vector<3x256xf32>
    %2 = arith.cmpf oge, %0, %1 : vector<3x256xf32>
    %cst_1 = arith.constant -1.800000e+00 : f32
    %3 = vector.broadcast %cst_1 : f32 to vector<3x256xf32>
    %4 = arith.cmpf olt, %0, %3 : vector<3x256xf32>
    %5 = arith.andi %2, %4 : vector<3x256xi1>
    %6 = arith.extui %5 : vector<3x256xi1> to vector<3x256xi32>
    %7 = arith.sitofp %6 : vector<3x256xi32> to vector<3x256xf32>
    %cst_2 = arith.constant -1.800000e+00 : f32
    %8 = vector.broadcast %cst_2 : f32 to vector<3x256xf32>
    %9 = arith.cmpf oge, %0, %8 : vector<3x256xf32>
    %cst_3 = arith.constant -1.400000e+00 : f32
    %10 = vector.broadcast %cst_3 : f32 to vector<3x256xf32>
    %11 = arith.cmpf olt, %0, %10 : vector<3x256xf32>
    %12 = arith.andi %9, %11 : vector<3x256xi1>
    %13 = arith.extui %12 : vector<3x256xi1> to vector<3x256xi32>
    %14 = arith.sitofp %13 : vector<3x256xi32> to vector<3x256xf32>
    %cst_4 = arith.constant -1.400000e+00 : f32
    %15 = vector.broadcast %cst_4 : f32 to vector<3x256xf32>
    %16 = arith.cmpf oge, %0, %15 : vector<3x256xf32>
    %cst_5 = arith.constant -1.000000e+00 : f32
    %17 = vector.broadcast %cst_5 : f32 to vector<3x256xf32>
    %18 = arith.cmpf olt, %0, %17 : vector<3x256xf32>
    %19 = arith.andi %16, %18 : vector<3x256xi1>
    %20 = arith.extui %19 : vector<3x256xi1> to vector<3x256xi32>
    %21 = arith.sitofp %20 : vector<3x256xi32> to vector<3x256xf32>
    %cst_6 = arith.constant -1.000000e+00 : f32
    %22 = vector.broadcast %cst_6 : f32 to vector<3x256xf32>
    %23 = arith.cmpf oge, %0, %22 : vector<3x256xf32>
    %cst_7 = arith.constant -6.000000e-01 : f32
    %24 = vector.broadcast %cst_7 : f32 to vector<3x256xf32>
    %25 = arith.cmpf olt, %0, %24 : vector<3x256xf32>
    %26 = arith.andi %23, %25 : vector<3x256xi1>
    %27 = arith.extui %26 : vector<3x256xi1> to vector<3x256xi32>
    %28 = arith.sitofp %27 : vector<3x256xi32> to vector<3x256xf32>
    %cst_8 = arith.constant -6.000000e-01 : f32
    %29 = vector.broadcast %cst_8 : f32 to vector<3x256xf32>
    %30 = arith.cmpf oge, %0, %29 : vector<3x256xf32>
    %cst_9 = arith.constant -0.200000018 : f32
    %31 = vector.broadcast %cst_9 : f32 to vector<3x256xf32>
    %32 = arith.cmpf olt, %0, %31 : vector<3x256xf32>
    %33 = arith.andi %30, %32 : vector<3x256xi1>
    %34 = arith.extui %33 : vector<3x256xi1> to vector<3x256xi32>
    %35 = arith.sitofp %34 : vector<3x256xi32> to vector<3x256xf32>
    %cst_10 = arith.constant -0.200000018 : f32
    %36 = vector.broadcast %cst_10 : f32 to vector<3x256xf32>
    %37 = arith.cmpf oge, %0, %36 : vector<3x256xf32>
    %cst_11 = arith.constant 0.200000033 : f32
    %38 = vector.broadcast %cst_11 : f32 to vector<3x256xf32>
    %39 = arith.cmpf olt, %0, %38 : vector<3x256xf32>
    %40 = arith.andi %37, %39 : vector<3x256xi1>
    %41 = arith.extui %40 : vector<3x256xi1> to vector<3x256xi32>
    %42 = arith.sitofp %41 : vector<3x256xi32> to vector<3x256xf32>
    %cst_12 = arith.constant 0.200000033 : f32
    %43 = vector.broadcast %cst_12 : f32 to vector<3x256xf32>
    %44 = arith.cmpf oge, %0, %43 : vector<3x256xf32>
    %cst_13 = arith.constant 6.000000e-01 : f32
    %45 = vector.broadcast %cst_13 : f32 to vector<3x256xf32>
    %46 = arith.cmpf olt, %0, %45 : vector<3x256xf32>
    %47 = arith.andi %44, %46 : vector<3x256xi1>
    %48 = arith.extui %47 : vector<3x256xi1> to vector<3x256xi32>
    %49 = arith.sitofp %48 : vector<3x256xi32> to vector<3x256xf32>
    %cst_14 = arith.constant 6.000000e-01 : f32
    %50 = vector.broadcast %cst_14 : f32 to vector<3x256xf32>
    %51 = arith.cmpf oge, %0, %50 : vector<3x256xf32>
    %cst_15 = arith.constant 1.000000e+00 : f32
    %52 = vector.broadcast %cst_15 : f32 to vector<3x256xf32>
    %53 = arith.cmpf olt, %0, %52 : vector<3x256xf32>
    %54 = arith.andi %51, %53 : vector<3x256xi1>
    %55 = arith.extui %54 : vector<3x256xi1> to vector<3x256xi32>
    %56 = arith.sitofp %55 : vector<3x256xi32> to vector<3x256xf32>
    %cst_16 = arith.constant 1.000000e+00 : f32
    %57 = vector.broadcast %cst_16 : f32 to vector<3x256xf32>
    %58 = arith.cmpf oge, %0, %57 : vector<3x256xf32>
    %cst_17 = arith.constant 1.400000e+00 : f32
    %59 = vector.broadcast %cst_17 : f32 to vector<3x256xf32>
    %60 = arith.cmpf olt, %0, %59 : vector<3x256xf32>
    %61 = arith.andi %58, %60 : vector<3x256xi1>
    %62 = arith.extui %61 : vector<3x256xi1> to vector<3x256xi32>
    %63 = arith.sitofp %62 : vector<3x256xi32> to vector<3x256xf32>
    %cst_18 = arith.constant 1.400000e+00 : f32
    %64 = vector.broadcast %cst_18 : f32 to vector<3x256xf32>
    %65 = arith.cmpf oge, %0, %64 : vector<3x256xf32>
    %cst_19 = arith.constant 1.800000e+00 : f32
    %66 = vector.broadcast %cst_19 : f32 to vector<3x256xf32>
    %67 = arith.cmpf olt, %0, %66 : vector<3x256xf32>
    %68 = arith.andi %65, %67 : vector<3x256xi1>
    %69 = arith.extui %68 : vector<3x256xi1> to vector<3x256xi32>
    %70 = arith.sitofp %69 : vector<3x256xi32> to vector<3x256xf32>
    %cst_20 = arith.constant 1.800000e+00 : f32
    %71 = vector.broadcast %cst_20 : f32 to vector<3x256xf32>
    %72 = arith.cmpf oge, %0, %71 : vector<3x256xf32>
    %cst_21 = arith.constant 2.200000e+00 : f32
    %73 = vector.broadcast %cst_21 : f32 to vector<3x256xf32>
    %74 = arith.cmpf olt, %0, %73 : vector<3x256xf32>
    %75 = arith.andi %72, %74 : vector<3x256xi1>
    %76 = arith.extui %75 : vector<3x256xi1> to vector<3x256xi32>
    %77 = arith.sitofp %76 : vector<3x256xi32> to vector<3x256xf32>
    %cst_22 = arith.constant -2.200000e+00 : f32
    %78 = vector.broadcast %cst_22 : f32 to vector<3x256xf32>
    %79 = arith.subf %0, %78 : vector<3x256xf32>
    %cst_23 = arith.constant 2.49999952 : f32
    %80 = vector.broadcast %cst_23 : f32 to vector<3x256xf32>
    %81 = arith.mulf %79, %80 : vector<3x256xf32>
    %82 = arith.mulf %81, %7 : vector<3x256xf32>
    %cst_24 = arith.constant -1.400000e+00 : f32
    %83 = vector.broadcast %cst_24 : f32 to vector<3x256xf32>
    %84 = arith.subf %83, %0 : vector<3x256xf32>
    %cst_25 = arith.constant 2.50000024 : f32
    %85 = vector.broadcast %cst_25 : f32 to vector<3x256xf32>
    %86 = arith.mulf %84, %85 : vector<3x256xf32>
    %87 = arith.mulf %86, %14 : vector<3x256xf32>
    %88 = arith.addf %82, %87 : vector<3x256xf32>
    %cst_26 = arith.constant -1.800000e+00 : f32
    %89 = vector.broadcast %cst_26 : f32 to vector<3x256xf32>
    %90 = arith.subf %0, %89 : vector<3x256xf32>
    %cst_27 = arith.constant 2.50000024 : f32
    %91 = vector.broadcast %cst_27 : f32 to vector<3x256xf32>
    %92 = arith.mulf %90, %91 : vector<3x256xf32>
    %93 = arith.mulf %92, %14 : vector<3x256xf32>
    %cst_28 = arith.constant -1.000000e+00 : f32
    %94 = vector.broadcast %cst_28 : f32 to vector<3x256xf32>
    %95 = arith.subf %94, %0 : vector<3x256xf32>
    %cst_29 = arith.constant 2.50000024 : f32
    %96 = vector.broadcast %cst_29 : f32 to vector<3x256xf32>
    %97 = arith.mulf %95, %96 : vector<3x256xf32>
    %98 = arith.mulf %97, %21 : vector<3x256xf32>
    %99 = arith.addf %93, %98 : vector<3x256xf32>
    %cst_30 = arith.constant -1.400000e+00 : f32
    %100 = vector.broadcast %cst_30 : f32 to vector<3x256xf32>
    %101 = arith.subf %0, %100 : vector<3x256xf32>
    %cst_31 = arith.constant 2.50000024 : f32
    %102 = vector.broadcast %cst_31 : f32 to vector<3x256xf32>
    %103 = arith.mulf %101, %102 : vector<3x256xf32>
    %104 = arith.mulf %103, %21 : vector<3x256xf32>
    %cst_32 = arith.constant -6.000000e-01 : f32
    %105 = vector.broadcast %cst_32 : f32 to vector<3x256xf32>
    %106 = arith.subf %105, %0 : vector<3x256xf32>
    %cst_33 = arith.constant 2.50000024 : f32
    %107 = vector.broadcast %cst_33 : f32 to vector<3x256xf32>
    %108 = arith.mulf %106, %107 : vector<3x256xf32>
    %109 = arith.mulf %108, %28 : vector<3x256xf32>
    %110 = arith.addf %104, %109 : vector<3x256xf32>
    %cst_34 = arith.constant -1.000000e+00 : f32
    %111 = vector.broadcast %cst_34 : f32 to vector<3x256xf32>
    %112 = arith.subf %0, %111 : vector<3x256xf32>
    %cst_35 = arith.constant 2.50000024 : f32
    %113 = vector.broadcast %cst_35 : f32 to vector<3x256xf32>
    %114 = arith.mulf %112, %113 : vector<3x256xf32>
    %115 = arith.mulf %114, %28 : vector<3x256xf32>
    %cst_36 = arith.constant -0.200000018 : f32
    %116 = vector.broadcast %cst_36 : f32 to vector<3x256xf32>
    %117 = arith.subf %116, %0 : vector<3x256xf32>
    %cst_37 = arith.constant 2.500000e+00 : f32
    %118 = vector.broadcast %cst_37 : f32 to vector<3x256xf32>
    %119 = arith.mulf %117, %118 : vector<3x256xf32>
    %120 = arith.mulf %119, %35 : vector<3x256xf32>
    %121 = arith.addf %115, %120 : vector<3x256xf32>
    %cst_38 = arith.constant -6.000000e-01 : f32
    %122 = vector.broadcast %cst_38 : f32 to vector<3x256xf32>
    %123 = arith.subf %0, %122 : vector<3x256xf32>
    %cst_39 = arith.constant 2.500000e+00 : f32
    %124 = vector.broadcast %cst_39 : f32 to vector<3x256xf32>
    %125 = arith.mulf %123, %124 : vector<3x256xf32>
    %126 = arith.mulf %125, %35 : vector<3x256xf32>
    %cst_40 = arith.constant 0.200000033 : f32
    %127 = vector.broadcast %cst_40 : f32 to vector<3x256xf32>
    %128 = arith.subf %127, %0 : vector<3x256xf32>
    %cst_41 = arith.constant 2.49999976 : f32
    %129 = vector.broadcast %cst_41 : f32 to vector<3x256xf32>
    %130 = arith.mulf %128, %129 : vector<3x256xf32>
    %131 = arith.mulf %130, %42 : vector<3x256xf32>
    %132 = arith.addf %126, %131 : vector<3x256xf32>
    %cst_42 = arith.constant -0.200000018 : f32
    %133 = vector.broadcast %cst_42 : f32 to vector<3x256xf32>
    %134 = arith.subf %0, %133 : vector<3x256xf32>
    %cst_43 = arith.constant 2.49999976 : f32
    %135 = vector.broadcast %cst_43 : f32 to vector<3x256xf32>
    %136 = arith.mulf %134, %135 : vector<3x256xf32>
    %137 = arith.mulf %136, %42 : vector<3x256xf32>
    %cst_44 = arith.constant 6.000000e-01 : f32
    %138 = vector.broadcast %cst_44 : f32 to vector<3x256xf32>
    %139 = arith.subf %138, %0 : vector<3x256xf32>
    %cst_45 = arith.constant 2.500000e+00 : f32
    %140 = vector.broadcast %cst_45 : f32 to vector<3x256xf32>
    %141 = arith.mulf %139, %140 : vector<3x256xf32>
    %142 = arith.mulf %141, %49 : vector<3x256xf32>
    %143 = arith.addf %137, %142 : vector<3x256xf32>
    %cst_46 = arith.constant 0.200000033 : f32
    %144 = vector.broadcast %cst_46 : f32 to vector<3x256xf32>
    %145 = arith.subf %0, %144 : vector<3x256xf32>
    %cst_47 = arith.constant 2.500000e+00 : f32
    %146 = vector.broadcast %cst_47 : f32 to vector<3x256xf32>
    %147 = arith.mulf %145, %146 : vector<3x256xf32>
    %148 = arith.mulf %147, %49 : vector<3x256xf32>
    %cst_48 = arith.constant 1.000000e+00 : f32
    %149 = vector.broadcast %cst_48 : f32 to vector<3x256xf32>
    %150 = arith.subf %149, %0 : vector<3x256xf32>
    %cst_49 = arith.constant 2.50000024 : f32
    %151 = vector.broadcast %cst_49 : f32 to vector<3x256xf32>
    %152 = arith.mulf %150, %151 : vector<3x256xf32>
    %153 = arith.mulf %152, %56 : vector<3x256xf32>
    %154 = arith.addf %148, %153 : vector<3x256xf32>
    %cst_50 = arith.constant 6.000000e-01 : f32
    %155 = vector.broadcast %cst_50 : f32 to vector<3x256xf32>
    %156 = arith.subf %0, %155 : vector<3x256xf32>
    %cst_51 = arith.constant 2.50000024 : f32
    %157 = vector.broadcast %cst_51 : f32 to vector<3x256xf32>
    %158 = arith.mulf %156, %157 : vector<3x256xf32>
    %159 = arith.mulf %158, %56 : vector<3x256xf32>
    %cst_52 = arith.constant 1.400000e+00 : f32
    %160 = vector.broadcast %cst_52 : f32 to vector<3x256xf32>
    %161 = arith.subf %160, %0 : vector<3x256xf32>
    %cst_53 = arith.constant 2.50000024 : f32
    %162 = vector.broadcast %cst_53 : f32 to vector<3x256xf32>
    %163 = arith.mulf %161, %162 : vector<3x256xf32>
    %164 = arith.mulf %163, %63 : vector<3x256xf32>
    %165 = arith.addf %159, %164 : vector<3x256xf32>
    %cst_54 = arith.constant 1.000000e+00 : f32
    %166 = vector.broadcast %cst_54 : f32 to vector<3x256xf32>
    %167 = arith.subf %0, %166 : vector<3x256xf32>
    %cst_55 = arith.constant 2.50000024 : f32
    %168 = vector.broadcast %cst_55 : f32 to vector<3x256xf32>
    %169 = arith.mulf %167, %168 : vector<3x256xf32>
    %170 = arith.mulf %169, %63 : vector<3x256xf32>
    %cst_56 = arith.constant 1.800000e+00 : f32
    %171 = vector.broadcast %cst_56 : f32 to vector<3x256xf32>
    %172 = arith.subf %171, %0 : vector<3x256xf32>
    %cst_57 = arith.constant 2.50000024 : f32
    %173 = vector.broadcast %cst_57 : f32 to vector<3x256xf32>
    %174 = arith.mulf %172, %173 : vector<3x256xf32>
    %175 = arith.mulf %174, %70 : vector<3x256xf32>
    %176 = arith.addf %170, %175 : vector<3x256xf32>
    %cst_58 = arith.constant 1.400000e+00 : f32
    %177 = vector.broadcast %cst_58 : f32 to vector<3x256xf32>
    %178 = arith.subf %0, %177 : vector<3x256xf32>
    %cst_59 = arith.constant 2.50000024 : f32
    %179 = vector.broadcast %cst_59 : f32 to vector<3x256xf32>
    %180 = arith.mulf %178, %179 : vector<3x256xf32>
    %181 = arith.mulf %180, %70 : vector<3x256xf32>
    %cst_60 = arith.constant 2.200000e+00 : f32
    %182 = vector.broadcast %cst_60 : f32 to vector<3x256xf32>
    %183 = arith.subf %182, %0 : vector<3x256xf32>
    %cst_61 = arith.constant 2.49999952 : f32
    %184 = vector.broadcast %cst_61 : f32 to vector<3x256xf32>
    %185 = arith.mulf %183, %184 : vector<3x256xf32>
    %186 = arith.mulf %185, %77 : vector<3x256xf32>
    %187 = arith.addf %181, %186 : vector<3x256xf32>
    %cst_62 = arith.constant -2.200000e+00 : f32
    %188 = vector.broadcast %cst_62 : f32 to vector<3x256xf32>
    %189 = arith.subf %0, %188 : vector<3x256xf32>
    %cst_63 = arith.constant 1.24999988 : f32
    %190 = vector.broadcast %cst_63 : f32 to vector<3x256xf32>
    %191 = arith.mulf %189, %190 : vector<3x256xf32>
    %192 = arith.mulf %191, %88 : vector<3x256xf32>
    %cst_64 = arith.constant -1.000000e+00 : f32
    %193 = vector.broadcast %cst_64 : f32 to vector<3x256xf32>
    %194 = arith.subf %193, %0 : vector<3x256xf32>
    %cst_65 = arith.constant 1.25000012 : f32
    %195 = vector.broadcast %cst_65 : f32 to vector<3x256xf32>
    %196 = arith.mulf %194, %195 : vector<3x256xf32>
    %197 = arith.mulf %196, %99 : vector<3x256xf32>
    %198 = arith.addf %192, %197 : vector<3x256xf32>
    %cst_66 = arith.constant -1.800000e+00 : f32
    %199 = vector.broadcast %cst_66 : f32 to vector<3x256xf32>
    %200 = arith.subf %0, %199 : vector<3x256xf32>
    %cst_67 = arith.constant 1.25000012 : f32
    %201 = vector.broadcast %cst_67 : f32 to vector<3x256xf32>
    %202 = arith.mulf %200, %201 : vector<3x256xf32>
    %203 = arith.mulf %202, %99 : vector<3x256xf32>
    %cst_68 = arith.constant -6.000000e-01 : f32
    %204 = vector.broadcast %cst_68 : f32 to vector<3x256xf32>
    %205 = arith.subf %204, %0 : vector<3x256xf32>
    %cst_69 = arith.constant 1.25000012 : f32
    %206 = vector.broadcast %cst_69 : f32 to vector<3x256xf32>
    %207 = arith.mulf %205, %206 : vector<3x256xf32>
    %208 = arith.mulf %207, %110 : vector<3x256xf32>
    %209 = arith.addf %203, %208 : vector<3x256xf32>
    %cst_70 = arith.constant -1.400000e+00 : f32
    %210 = vector.broadcast %cst_70 : f32 to vector<3x256xf32>
    %211 = arith.subf %0, %210 : vector<3x256xf32>
    %cst_71 = arith.constant 1.25000012 : f32
    %212 = vector.broadcast %cst_71 : f32 to vector<3x256xf32>
    %213 = arith.mulf %211, %212 : vector<3x256xf32>
    %214 = arith.mulf %213, %110 : vector<3x256xf32>
    %cst_72 = arith.constant -0.200000018 : f32
    %215 = vector.broadcast %cst_72 : f32 to vector<3x256xf32>
    %216 = arith.subf %215, %0 : vector<3x256xf32>
    %cst_73 = arith.constant 1.250000e+00 : f32
    %217 = vector.broadcast %cst_73 : f32 to vector<3x256xf32>
    %218 = arith.mulf %216, %217 : vector<3x256xf32>
    %219 = arith.mulf %218, %121 : vector<3x256xf32>
    %220 = arith.addf %214, %219 : vector<3x256xf32>
    %cst_74 = arith.constant -1.000000e+00 : f32
    %221 = vector.broadcast %cst_74 : f32 to vector<3x256xf32>
    %222 = arith.subf %0, %221 : vector<3x256xf32>
    %cst_75 = arith.constant 1.250000e+00 : f32
    %223 = vector.broadcast %cst_75 : f32 to vector<3x256xf32>
    %224 = arith.mulf %222, %223 : vector<3x256xf32>
    %225 = arith.mulf %224, %121 : vector<3x256xf32>
    %cst_76 = arith.constant 0.200000033 : f32
    %226 = vector.broadcast %cst_76 : f32 to vector<3x256xf32>
    %227 = arith.subf %226, %0 : vector<3x256xf32>
    %cst_77 = arith.constant 1.24999988 : f32
    %228 = vector.broadcast %cst_77 : f32 to vector<3x256xf32>
    %229 = arith.mulf %227, %228 : vector<3x256xf32>
    %230 = arith.mulf %229, %132 : vector<3x256xf32>
    %231 = arith.addf %225, %230 : vector<3x256xf32>
    %cst_78 = arith.constant -6.000000e-01 : f32
    %232 = vector.broadcast %cst_78 : f32 to vector<3x256xf32>
    %233 = arith.subf %0, %232 : vector<3x256xf32>
    %cst_79 = arith.constant 1.24999988 : f32
    %234 = vector.broadcast %cst_79 : f32 to vector<3x256xf32>
    %235 = arith.mulf %233, %234 : vector<3x256xf32>
    %236 = arith.mulf %235, %132 : vector<3x256xf32>
    %cst_80 = arith.constant 6.000000e-01 : f32
    %237 = vector.broadcast %cst_80 : f32 to vector<3x256xf32>
    %238 = arith.subf %237, %0 : vector<3x256xf32>
    %cst_81 = arith.constant 1.24999988 : f32
    %239 = vector.broadcast %cst_81 : f32 to vector<3x256xf32>
    %240 = arith.mulf %238, %239 : vector<3x256xf32>
    %241 = arith.mulf %240, %143 : vector<3x256xf32>
    %242 = arith.addf %236, %241 : vector<3x256xf32>
    %cst_82 = arith.constant -0.200000018 : f32
    %243 = vector.broadcast %cst_82 : f32 to vector<3x256xf32>
    %244 = arith.subf %0, %243 : vector<3x256xf32>
    %cst_83 = arith.constant 1.24999988 : f32
    %245 = vector.broadcast %cst_83 : f32 to vector<3x256xf32>
    %246 = arith.mulf %244, %245 : vector<3x256xf32>
    %247 = arith.mulf %246, %143 : vector<3x256xf32>
    %cst_84 = arith.constant 1.000000e+00 : f32
    %248 = vector.broadcast %cst_84 : f32 to vector<3x256xf32>
    %249 = arith.subf %248, %0 : vector<3x256xf32>
    %cst_85 = arith.constant 1.250000e+00 : f32
    %250 = vector.broadcast %cst_85 : f32 to vector<3x256xf32>
    %251 = arith.mulf %249, %250 : vector<3x256xf32>
    %252 = arith.mulf %251, %154 : vector<3x256xf32>
    %253 = arith.addf %247, %252 : vector<3x256xf32>
    %cst_86 = arith.constant 0.200000033 : f32
    %254 = vector.broadcast %cst_86 : f32 to vector<3x256xf32>
    %255 = arith.subf %0, %254 : vector<3x256xf32>
    %cst_87 = arith.constant 1.250000e+00 : f32
    %256 = vector.broadcast %cst_87 : f32 to vector<3x256xf32>
    %257 = arith.mulf %255, %256 : vector<3x256xf32>
    %258 = arith.mulf %257, %154 : vector<3x256xf32>
    %cst_88 = arith.constant 1.400000e+00 : f32
    %259 = vector.broadcast %cst_88 : f32 to vector<3x256xf32>
    %260 = arith.subf %259, %0 : vector<3x256xf32>
    %cst_89 = arith.constant 1.25000012 : f32
    %261 = vector.broadcast %cst_89 : f32 to vector<3x256xf32>
    %262 = arith.mulf %260, %261 : vector<3x256xf32>
    %263 = arith.mulf %262, %165 : vector<3x256xf32>
    %264 = arith.addf %258, %263 : vector<3x256xf32>
    %cst_90 = arith.constant 6.000000e-01 : f32
    %265 = vector.broadcast %cst_90 : f32 to vector<3x256xf32>
    %266 = arith.subf %0, %265 : vector<3x256xf32>
    %cst_91 = arith.constant 1.25000012 : f32
    %267 = vector.broadcast %cst_91 : f32 to vector<3x256xf32>
    %268 = arith.mulf %266, %267 : vector<3x256xf32>
    %269 = arith.mulf %268, %165 : vector<3x256xf32>
    %cst_92 = arith.constant 1.800000e+00 : f32
    %270 = vector.broadcast %cst_92 : f32 to vector<3x256xf32>
    %271 = arith.subf %270, %0 : vector<3x256xf32>
    %cst_93 = arith.constant 1.25000012 : f32
    %272 = vector.broadcast %cst_93 : f32 to vector<3x256xf32>
    %273 = arith.mulf %271, %272 : vector<3x256xf32>
    %274 = arith.mulf %273, %176 : vector<3x256xf32>
    %275 = arith.addf %269, %274 : vector<3x256xf32>
    %cst_94 = arith.constant 1.000000e+00 : f32
    %276 = vector.broadcast %cst_94 : f32 to vector<3x256xf32>
    %277 = arith.subf %0, %276 : vector<3x256xf32>
    %cst_95 = arith.constant 1.25000012 : f32
    %278 = vector.broadcast %cst_95 : f32 to vector<3x256xf32>
    %279 = arith.mulf %277, %278 : vector<3x256xf32>
    %280 = arith.mulf %279, %176 : vector<3x256xf32>
    %cst_96 = arith.constant 2.200000e+00 : f32
    %281 = vector.broadcast %cst_96 : f32 to vector<3x256xf32>
    %282 = arith.subf %281, %0 : vector<3x256xf32>
    %cst_97 = arith.constant 1.24999988 : f32
    %283 = vector.broadcast %cst_97 : f32 to vector<3x256xf32>
    %284 = arith.mulf %282, %283 : vector<3x256xf32>
    %285 = arith.mulf %284, %187 : vector<3x256xf32>
    %286 = arith.addf %280, %285 : vector<3x256xf32>
    %cst_98 = arith.constant -2.200000e+00 : f32
    %287 = vector.broadcast %cst_98 : f32 to vector<3x256xf32>
    %288 = arith.subf %0, %287 : vector<3x256xf32>
    %cst_99 = arith.constant 0.833333313 : f32
    %289 = vector.broadcast %cst_99 : f32 to vector<3x256xf32>
    %290 = arith.mulf %288, %289 : vector<3x256xf32>
    %291 = arith.mulf %290, %198 : vector<3x256xf32>
    %cst_100 = arith.constant -6.000000e-01 : f32
    %292 = vector.broadcast %cst_100 : f32 to vector<3x256xf32>
    %293 = arith.subf %292, %0 : vector<3x256xf32>
    %cst_101 = arith.constant 0.833333373 : f32
    %294 = vector.broadcast %cst_101 : f32 to vector<3x256xf32>
    %295 = arith.mulf %293, %294 : vector<3x256xf32>
    %296 = arith.mulf %295, %209 : vector<3x256xf32>
    %297 = arith.addf %291, %296 : vector<3x256xf32>
    %cst_102 = arith.constant -1.800000e+00 : f32
    %298 = vector.broadcast %cst_102 : f32 to vector<3x256xf32>
    %299 = arith.subf %0, %298 : vector<3x256xf32>
    %cst_103 = arith.constant 0.833333373 : f32
    %300 = vector.broadcast %cst_103 : f32 to vector<3x256xf32>
    %301 = arith.mulf %299, %300 : vector<3x256xf32>
    %302 = arith.mulf %301, %209 : vector<3x256xf32>
    %cst_104 = arith.constant -0.200000018 : f32
    %303 = vector.broadcast %cst_104 : f32 to vector<3x256xf32>
    %304 = arith.subf %303, %0 : vector<3x256xf32>
    %cst_105 = arith.constant 0.833333373 : f32
    %305 = vector.broadcast %cst_105 : f32 to vector<3x256xf32>
    %306 = arith.mulf %304, %305 : vector<3x256xf32>
    %307 = arith.mulf %306, %220 : vector<3x256xf32>
    %308 = arith.addf %302, %307 : vector<3x256xf32>
    %cst_106 = arith.constant -1.400000e+00 : f32
    %309 = vector.broadcast %cst_106 : f32 to vector<3x256xf32>
    %310 = arith.subf %0, %309 : vector<3x256xf32>
    %cst_107 = arith.constant 0.833333373 : f32
    %311 = vector.broadcast %cst_107 : f32 to vector<3x256xf32>
    %312 = arith.mulf %310, %311 : vector<3x256xf32>
    %313 = arith.mulf %312, %220 : vector<3x256xf32>
    %cst_108 = arith.constant 0.200000033 : f32
    %314 = vector.broadcast %cst_108 : f32 to vector<3x256xf32>
    %315 = arith.subf %314, %0 : vector<3x256xf32>
    %cst_109 = arith.constant 0.833333313 : f32
    %316 = vector.broadcast %cst_109 : f32 to vector<3x256xf32>
    %317 = arith.mulf %315, %316 : vector<3x256xf32>
    %318 = arith.mulf %317, %231 : vector<3x256xf32>
    %319 = arith.addf %313, %318 : vector<3x256xf32>
    %cst_110 = arith.constant -1.000000e+00 : f32
    %320 = vector.broadcast %cst_110 : f32 to vector<3x256xf32>
    %321 = arith.subf %0, %320 : vector<3x256xf32>
    %cst_111 = arith.constant 0.833333313 : f32
    %322 = vector.broadcast %cst_111 : f32 to vector<3x256xf32>
    %323 = arith.mulf %321, %322 : vector<3x256xf32>
    %324 = arith.mulf %323, %231 : vector<3x256xf32>
    %cst_112 = arith.constant 6.000000e-01 : f32
    %325 = vector.broadcast %cst_112 : f32 to vector<3x256xf32>
    %326 = arith.subf %325, %0 : vector<3x256xf32>
    %cst_113 = arith.constant 0.833333313 : f32
    %327 = vector.broadcast %cst_113 : f32 to vector<3x256xf32>
    %328 = arith.mulf %326, %327 : vector<3x256xf32>
    %329 = arith.mulf %328, %242 : vector<3x256xf32>
    %330 = arith.addf %324, %329 : vector<3x256xf32>
    %cst_114 = arith.constant -6.000000e-01 : f32
    %331 = vector.broadcast %cst_114 : f32 to vector<3x256xf32>
    %332 = arith.subf %0, %331 : vector<3x256xf32>
    %cst_115 = arith.constant 0.833333313 : f32
    %333 = vector.broadcast %cst_115 : f32 to vector<3x256xf32>
    %334 = arith.mulf %332, %333 : vector<3x256xf32>
    %335 = arith.mulf %334, %242 : vector<3x256xf32>
    %cst_116 = arith.constant 1.000000e+00 : f32
    %336 = vector.broadcast %cst_116 : f32 to vector<3x256xf32>
    %337 = arith.subf %336, %0 : vector<3x256xf32>
    %cst_117 = arith.constant 0.833333313 : f32
    %338 = vector.broadcast %cst_117 : f32 to vector<3x256xf32>
    %339 = arith.mulf %337, %338 : vector<3x256xf32>
    %340 = arith.mulf %339, %253 : vector<3x256xf32>
    %341 = arith.addf %335, %340 : vector<3x256xf32>
    %cst_118 = arith.constant -0.200000018 : f32
    %342 = vector.broadcast %cst_118 : f32 to vector<3x256xf32>
    %343 = arith.subf %0, %342 : vector<3x256xf32>
    %cst_119 = arith.constant 0.833333313 : f32
    %344 = vector.broadcast %cst_119 : f32 to vector<3x256xf32>
    %345 = arith.mulf %343, %344 : vector<3x256xf32>
    %346 = arith.mulf %345, %253 : vector<3x256xf32>
    %cst_120 = arith.constant 1.400000e+00 : f32
    %347 = vector.broadcast %cst_120 : f32 to vector<3x256xf32>
    %348 = arith.subf %347, %0 : vector<3x256xf32>
    %cst_121 = arith.constant 0.833333373 : f32
    %349 = vector.broadcast %cst_121 : f32 to vector<3x256xf32>
    %350 = arith.mulf %348, %349 : vector<3x256xf32>
    %351 = arith.mulf %350, %264 : vector<3x256xf32>
    %352 = arith.addf %346, %351 : vector<3x256xf32>
    %cst_122 = arith.constant 0.200000033 : f32
    %353 = vector.broadcast %cst_122 : f32 to vector<3x256xf32>
    %354 = arith.subf %0, %353 : vector<3x256xf32>
    %cst_123 = arith.constant 0.833333373 : f32
    %355 = vector.broadcast %cst_123 : f32 to vector<3x256xf32>
    %356 = arith.mulf %354, %355 : vector<3x256xf32>
    %357 = arith.mulf %356, %264 : vector<3x256xf32>
    %cst_124 = arith.constant 1.800000e+00 : f32
    %358 = vector.broadcast %cst_124 : f32 to vector<3x256xf32>
    %359 = arith.subf %358, %0 : vector<3x256xf32>
    %cst_125 = arith.constant 0.833333373 : f32
    %360 = vector.broadcast %cst_125 : f32 to vector<3x256xf32>
    %361 = arith.mulf %359, %360 : vector<3x256xf32>
    %362 = arith.mulf %361, %275 : vector<3x256xf32>
    %363 = arith.addf %357, %362 : vector<3x256xf32>
    %cst_126 = arith.constant 6.000000e-01 : f32
    %364 = vector.broadcast %cst_126 : f32 to vector<3x256xf32>
    %365 = arith.subf %0, %364 : vector<3x256xf32>
    %cst_127 = arith.constant 0.833333373 : f32
    %366 = vector.broadcast %cst_127 : f32 to vector<3x256xf32>
    %367 = arith.mulf %365, %366 : vector<3x256xf32>
    %368 = arith.mulf %367, %275 : vector<3x256xf32>
    %cst_128 = arith.constant 2.200000e+00 : f32
    %369 = vector.broadcast %cst_128 : f32 to vector<3x256xf32>
    %370 = arith.subf %369, %0 : vector<3x256xf32>
    %cst_129 = arith.constant 0.833333313 : f32
    %371 = vector.broadcast %cst_129 : f32 to vector<3x256xf32>
    %372 = arith.mulf %370, %371 : vector<3x256xf32>
    %373 = arith.mulf %372, %286 : vector<3x256xf32>
    %374 = arith.addf %368, %373 : vector<3x256xf32>
    %375 = tpu.concatenate %297, %308, %319, %330, %341, %352, %363, %374 in 0 : vector<3x256xf32>, vector<3x256xf32>, vector<3x256xf32>, vector<3x256xf32>, vector<3x256xf32>, vector<3x256xf32>, vector<3x256xf32>, vector<3x256xf32> -> vector<24x256xf32>
    %c0_130 = arith.constant 0 : index
    %c0_131 = arith.constant 0 : index
    %376 = vector.load %arg2[%c0_130, %c0_131] : memref<4x24xf32, #tpu.memory_space<vmem>>, vector<4x24xf32>
    %cst_132 = arith.constant dense<0.000000e+00> : vector<4x256xf32>
    %377 = tpu.matmul %376, %375, %cst_132 {dimension_numbers = #tpu.dot_dimension_numbers<[1], [0], [0], [1], [0, 0, 1, 1], [], []>} : vector<4x24xf32>, vector<24x256xf32>, vector<4x256xf32> -> vector<4x256xf32>
    %cst_133 = arith.constant -2.200000e+00 : f32
    %378 = vector.broadcast %cst_133 : f32 to vector<4x256xf32>
    %379 = arith.cmpf oge, %377, %378 : vector<4x256xf32>
    %cst_134 = arith.constant -1.800000e+00 : f32
    %380 = vector.broadcast %cst_134 : f32 to vector<4x256xf32>
    %381 = arith.cmpf olt, %377, %380 : vector<4x256xf32>
    %382 = arith.andi %379, %381 : vector<4x256xi1>
    %383 = arith.extui %382 : vector<4x256xi1> to vector<4x256xi32>
    %384 = arith.sitofp %383 : vector<4x256xi32> to vector<4x256xf32>
    %cst_135 = arith.constant -1.800000e+00 : f32
    %385 = vector.broadcast %cst_135 : f32 to vector<4x256xf32>
    %386 = arith.cmpf oge, %377, %385 : vector<4x256xf32>
    %cst_136 = arith.constant -1.400000e+00 : f32
    %387 = vector.broadcast %cst_136 : f32 to vector<4x256xf32>
    %388 = arith.cmpf olt, %377, %387 : vector<4x256xf32>
    %389 = arith.andi %386, %388 : vector<4x256xi1>
    %390 = arith.extui %389 : vector<4x256xi1> to vector<4x256xi32>
    %391 = arith.sitofp %390 : vector<4x256xi32> to vector<4x256xf32>
    %cst_137 = arith.constant -1.400000e+00 : f32
    %392 = vector.broadcast %cst_137 : f32 to vector<4x256xf32>
    %393 = arith.cmpf oge, %377, %392 : vector<4x256xf32>
    %cst_138 = arith.constant -1.000000e+00 : f32
    %394 = vector.broadcast %cst_138 : f32 to vector<4x256xf32>
    %395 = arith.cmpf olt, %377, %394 : vector<4x256xf32>
    %396 = arith.andi %393, %395 : vector<4x256xi1>
    %397 = arith.extui %396 : vector<4x256xi1> to vector<4x256xi32>
    %398 = arith.sitofp %397 : vector<4x256xi32> to vector<4x256xf32>
    %cst_139 = arith.constant -1.000000e+00 : f32
    %399 = vector.broadcast %cst_139 : f32 to vector<4x256xf32>
    %400 = arith.cmpf oge, %377, %399 : vector<4x256xf32>
    %cst_140 = arith.constant -6.000000e-01 : f32
    %401 = vector.broadcast %cst_140 : f32 to vector<4x256xf32>
    %402 = arith.cmpf olt, %377, %401 : vector<4x256xf32>
    %403 = arith.andi %400, %402 : vector<4x256xi1>
    %404 = arith.extui %403 : vector<4x256xi1> to vector<4x256xi32>
    %405 = arith.sitofp %404 : vector<4x256xi32> to vector<4x256xf32>
    %cst_141 = arith.constant -6.000000e-01 : f32
    %406 = vector.broadcast %cst_141 : f32 to vector<4x256xf32>
    %407 = arith.cmpf oge, %377, %406 : vector<4x256xf32>
    %cst_142 = arith.constant -0.200000018 : f32
    %408 = vector.broadcast %cst_142 : f32 to vector<4x256xf32>
    %409 = arith.cmpf olt, %377, %408 : vector<4x256xf32>
    %410 = arith.andi %407, %409 : vector<4x256xi1>
    %411 = arith.extui %410 : vector<4x256xi1> to vector<4x256xi32>
    %412 = arith.sitofp %411 : vector<4x256xi32> to vector<4x256xf32>
    %cst_143 = arith.constant -0.200000018 : f32
    %413 = vector.broadcast %cst_143 : f32 to vector<4x256xf32>
    %414 = arith.cmpf oge, %377, %413 : vector<4x256xf32>
    %cst_144 = arith.constant 0.200000033 : f32
    %415 = vector.broadcast %cst_144 : f32 to vector<4x256xf32>
    %416 = arith.cmpf olt, %377, %415 : vector<4x256xf32>
    %417 = arith.andi %414, %416 : vector<4x256xi1>
    %418 = arith.extui %417 : vector<4x256xi1> to vector<4x256xi32>
    %419 = arith.sitofp %418 : vector<4x256xi32> to vector<4x256xf32>
    %cst_145 = arith.constant 0.200000033 : f32
    %420 = vector.broadcast %cst_145 : f32 to vector<4x256xf32>
    %421 = arith.cmpf oge, %377, %420 : vector<4x256xf32>
    %cst_146 = arith.constant 6.000000e-01 : f32
    %422 = vector.broadcast %cst_146 : f32 to vector<4x256xf32>
    %423 = arith.cmpf olt, %377, %422 : vector<4x256xf32>
    %424 = arith.andi %421, %423 : vector<4x256xi1>
    %425 = arith.extui %424 : vector<4x256xi1> to vector<4x256xi32>
    %426 = arith.sitofp %425 : vector<4x256xi32> to vector<4x256xf32>
    %cst_147 = arith.constant 6.000000e-01 : f32
    %427 = vector.broadcast %cst_147 : f32 to vector<4x256xf32>
    %428 = arith.cmpf oge, %377, %427 : vector<4x256xf32>
    %cst_148 = arith.constant 1.000000e+00 : f32
    %429 = vector.broadcast %cst_148 : f32 to vector<4x256xf32>
    %430 = arith.cmpf olt, %377, %429 : vector<4x256xf32>
    %431 = arith.andi %428, %430 : vector<4x256xi1>
    %432 = arith.extui %431 : vector<4x256xi1> to vector<4x256xi32>
    %433 = arith.sitofp %432 : vector<4x256xi32> to vector<4x256xf32>
    %cst_149 = arith.constant 1.000000e+00 : f32
    %434 = vector.broadcast %cst_149 : f32 to vector<4x256xf32>
    %435 = arith.cmpf oge, %377, %434 : vector<4x256xf32>
    %cst_150 = arith.constant 1.400000e+00 : f32
    %436 = vector.broadcast %cst_150 : f32 to vector<4x256xf32>
    %437 = arith.cmpf olt, %377, %436 : vector<4x256xf32>
    %438 = arith.andi %435, %437 : vector<4x256xi1>
    %439 = arith.extui %438 : vector<4x256xi1> to vector<4x256xi32>
    %440 = arith.sitofp %439 : vector<4x256xi32> to vector<4x256xf32>
    %cst_151 = arith.constant 1.400000e+00 : f32
    %441 = vector.broadcast %cst_151 : f32 to vector<4x256xf32>
    %442 = arith.cmpf oge, %377, %441 : vector<4x256xf32>
    %cst_152 = arith.constant 1.800000e+00 : f32
    %443 = vector.broadcast %cst_152 : f32 to vector<4x256xf32>
    %444 = arith.cmpf olt, %377, %443 : vector<4x256xf32>
    %445 = arith.andi %442, %444 : vector<4x256xi1>
    %446 = arith.extui %445 : vector<4x256xi1> to vector<4x256xi32>
    %447 = arith.sitofp %446 : vector<4x256xi32> to vector<4x256xf32>
    %cst_153 = arith.constant 1.800000e+00 : f32
    %448 = vector.broadcast %cst_153 : f32 to vector<4x256xf32>
    %449 = arith.cmpf oge, %377, %448 : vector<4x256xf32>
    %cst_154 = arith.constant 2.200000e+00 : f32
    %450 = vector.broadcast %cst_154 : f32 to vector<4x256xf32>
    %451 = arith.cmpf olt, %377, %450 : vector<4x256xf32>
    %452 = arith.andi %449, %451 : vector<4x256xi1>
    %453 = arith.extui %452 : vector<4x256xi1> to vector<4x256xi32>
    %454 = arith.sitofp %453 : vector<4x256xi32> to vector<4x256xf32>
    %cst_155 = arith.constant -2.200000e+00 : f32
    %455 = vector.broadcast %cst_155 : f32 to vector<4x256xf32>
    %456 = arith.subf %377, %455 : vector<4x256xf32>
    %cst_156 = arith.constant 2.49999952 : f32
    %457 = vector.broadcast %cst_156 : f32 to vector<4x256xf32>
    %458 = arith.mulf %456, %457 : vector<4x256xf32>
    %459 = arith.mulf %458, %384 : vector<4x256xf32>
    %cst_157 = arith.constant -1.400000e+00 : f32
    %460 = vector.broadcast %cst_157 : f32 to vector<4x256xf32>
    %461 = arith.subf %460, %377 : vector<4x256xf32>
    %cst_158 = arith.constant 2.50000024 : f32
    %462 = vector.broadcast %cst_158 : f32 to vector<4x256xf32>
    %463 = arith.mulf %461, %462 : vector<4x256xf32>
    %464 = arith.mulf %463, %391 : vector<4x256xf32>
    %465 = arith.addf %459, %464 : vector<4x256xf32>
    %cst_159 = arith.constant -1.800000e+00 : f32
    %466 = vector.broadcast %cst_159 : f32 to vector<4x256xf32>
    %467 = arith.subf %377, %466 : vector<4x256xf32>
    %cst_160 = arith.constant 2.50000024 : f32
    %468 = vector.broadcast %cst_160 : f32 to vector<4x256xf32>
    %469 = arith.mulf %467, %468 : vector<4x256xf32>
    %470 = arith.mulf %469, %391 : vector<4x256xf32>
    %cst_161 = arith.constant -1.000000e+00 : f32
    %471 = vector.broadcast %cst_161 : f32 to vector<4x256xf32>
    %472 = arith.subf %471, %377 : vector<4x256xf32>
    %cst_162 = arith.constant 2.50000024 : f32
    %473 = vector.broadcast %cst_162 : f32 to vector<4x256xf32>
    %474 = arith.mulf %472, %473 : vector<4x256xf32>
    %475 = arith.mulf %474, %398 : vector<4x256xf32>
    %476 = arith.addf %470, %475 : vector<4x256xf32>
    %cst_163 = arith.constant -1.400000e+00 : f32
    %477 = vector.broadcast %cst_163 : f32 to vector<4x256xf32>
    %478 = arith.subf %377, %477 : vector<4x256xf32>
    %cst_164 = arith.constant 2.50000024 : f32
    %479 = vector.broadcast %cst_164 : f32 to vector<4x256xf32>
    %480 = arith.mulf %478, %479 : vector<4x256xf32>
    %481 = arith.mulf %480, %398 : vector<4x256xf32>
    %cst_165 = arith.constant -6.000000e-01 : f32
    %482 = vector.broadcast %cst_165 : f32 to vector<4x256xf32>
    %483 = arith.subf %482, %377 : vector<4x256xf32>
    %cst_166 = arith.constant 2.50000024 : f32
    %484 = vector.broadcast %cst_166 : f32 to vector<4x256xf32>
    %485 = arith.mulf %483, %484 : vector<4x256xf32>
    %486 = arith.mulf %485, %405 : vector<4x256xf32>
    %487 = arith.addf %481, %486 : vector<4x256xf32>
    %cst_167 = arith.constant -1.000000e+00 : f32
    %488 = vector.broadcast %cst_167 : f32 to vector<4x256xf32>
    %489 = arith.subf %377, %488 : vector<4x256xf32>
    %cst_168 = arith.constant 2.50000024 : f32
    %490 = vector.broadcast %cst_168 : f32 to vector<4x256xf32>
    %491 = arith.mulf %489, %490 : vector<4x256xf32>
    %492 = arith.mulf %491, %405 : vector<4x256xf32>
    %cst_169 = arith.constant -0.200000018 : f32
    %493 = vector.broadcast %cst_169 : f32 to vector<4x256xf32>
    %494 = arith.subf %493, %377 : vector<4x256xf32>
    %cst_170 = arith.constant 2.500000e+00 : f32
    %495 = vector.broadcast %cst_170 : f32 to vector<4x256xf32>
    %496 = arith.mulf %494, %495 : vector<4x256xf32>
    %497 = arith.mulf %496, %412 : vector<4x256xf32>
    %498 = arith.addf %492, %497 : vector<4x256xf32>
    %cst_171 = arith.constant -6.000000e-01 : f32
    %499 = vector.broadcast %cst_171 : f32 to vector<4x256xf32>
    %500 = arith.subf %377, %499 : vector<4x256xf32>
    %cst_172 = arith.constant 2.500000e+00 : f32
    %501 = vector.broadcast %cst_172 : f32 to vector<4x256xf32>
    %502 = arith.mulf %500, %501 : vector<4x256xf32>
    %503 = arith.mulf %502, %412 : vector<4x256xf32>
    %cst_173 = arith.constant 0.200000033 : f32
    %504 = vector.broadcast %cst_173 : f32 to vector<4x256xf32>
    %505 = arith.subf %504, %377 : vector<4x256xf32>
    %cst_174 = arith.constant 2.49999976 : f32
    %506 = vector.broadcast %cst_174 : f32 to vector<4x256xf32>
    %507 = arith.mulf %505, %506 : vector<4x256xf32>
    %508 = arith.mulf %507, %419 : vector<4x256xf32>
    %509 = arith.addf %503, %508 : vector<4x256xf32>
    %cst_175 = arith.constant -0.200000018 : f32
    %510 = vector.broadcast %cst_175 : f32 to vector<4x256xf32>
    %511 = arith.subf %377, %510 : vector<4x256xf32>
    %cst_176 = arith.constant 2.49999976 : f32
    %512 = vector.broadcast %cst_176 : f32 to vector<4x256xf32>
    %513 = arith.mulf %511, %512 : vector<4x256xf32>
    %514 = arith.mulf %513, %419 : vector<4x256xf32>
    %cst_177 = arith.constant 6.000000e-01 : f32
    %515 = vector.broadcast %cst_177 : f32 to vector<4x256xf32>
    %516 = arith.subf %515, %377 : vector<4x256xf32>
    %cst_178 = arith.constant 2.500000e+00 : f32
    %517 = vector.broadcast %cst_178 : f32 to vector<4x256xf32>
    %518 = arith.mulf %516, %517 : vector<4x256xf32>
    %519 = arith.mulf %518, %426 : vector<4x256xf32>
    %520 = arith.addf %514, %519 : vector<4x256xf32>
    %cst_179 = arith.constant 0.200000033 : f32
    %521 = vector.broadcast %cst_179 : f32 to vector<4x256xf32>
    %522 = arith.subf %377, %521 : vector<4x256xf32>
    %cst_180 = arith.constant 2.500000e+00 : f32
    %523 = vector.broadcast %cst_180 : f32 to vector<4x256xf32>
    %524 = arith.mulf %522, %523 : vector<4x256xf32>
    %525 = arith.mulf %524, %426 : vector<4x256xf32>
    %cst_181 = arith.constant 1.000000e+00 : f32
    %526 = vector.broadcast %cst_181 : f32 to vector<4x256xf32>
    %527 = arith.subf %526, %377 : vector<4x256xf32>
    %cst_182 = arith.constant 2.50000024 : f32
    %528 = vector.broadcast %cst_182 : f32 to vector<4x256xf32>
    %529 = arith.mulf %527, %528 : vector<4x256xf32>
    %530 = arith.mulf %529, %433 : vector<4x256xf32>
    %531 = arith.addf %525, %530 : vector<4x256xf32>
    %cst_183 = arith.constant 6.000000e-01 : f32
    %532 = vector.broadcast %cst_183 : f32 to vector<4x256xf32>
    %533 = arith.subf %377, %532 : vector<4x256xf32>
    %cst_184 = arith.constant 2.50000024 : f32
    %534 = vector.broadcast %cst_184 : f32 to vector<4x256xf32>
    %535 = arith.mulf %533, %534 : vector<4x256xf32>
    %536 = arith.mulf %535, %433 : vector<4x256xf32>
    %cst_185 = arith.constant 1.400000e+00 : f32
    %537 = vector.broadcast %cst_185 : f32 to vector<4x256xf32>
    %538 = arith.subf %537, %377 : vector<4x256xf32>
    %cst_186 = arith.constant 2.50000024 : f32
    %539 = vector.broadcast %cst_186 : f32 to vector<4x256xf32>
    %540 = arith.mulf %538, %539 : vector<4x256xf32>
    %541 = arith.mulf %540, %440 : vector<4x256xf32>
    %542 = arith.addf %536, %541 : vector<4x256xf32>
    %cst_187 = arith.constant 1.000000e+00 : f32
    %543 = vector.broadcast %cst_187 : f32 to vector<4x256xf32>
    %544 = arith.subf %377, %543 : vector<4x256xf32>
    %cst_188 = arith.constant 2.50000024 : f32
    %545 = vector.broadcast %cst_188 : f32 to vector<4x256xf32>
    %546 = arith.mulf %544, %545 : vector<4x256xf32>
    %547 = arith.mulf %546, %440 : vector<4x256xf32>
    %cst_189 = arith.constant 1.800000e+00 : f32
    %548 = vector.broadcast %cst_189 : f32 to vector<4x256xf32>
    %549 = arith.subf %548, %377 : vector<4x256xf32>
    %cst_190 = arith.constant 2.50000024 : f32
    %550 = vector.broadcast %cst_190 : f32 to vector<4x256xf32>
    %551 = arith.mulf %549, %550 : vector<4x256xf32>
    %552 = arith.mulf %551, %447 : vector<4x256xf32>
    %553 = arith.addf %547, %552 : vector<4x256xf32>
    %cst_191 = arith.constant 1.400000e+00 : f32
    %554 = vector.broadcast %cst_191 : f32 to vector<4x256xf32>
    %555 = arith.subf %377, %554 : vector<4x256xf32>
    %cst_192 = arith.constant 2.50000024 : f32
    %556 = vector.broadcast %cst_192 : f32 to vector<4x256xf32>
    %557 = arith.mulf %555, %556 : vector<4x256xf32>
    %558 = arith.mulf %557, %447 : vector<4x256xf32>
    %cst_193 = arith.constant 2.200000e+00 : f32
    %559 = vector.broadcast %cst_193 : f32 to vector<4x256xf32>
    %560 = arith.subf %559, %377 : vector<4x256xf32>
    %cst_194 = arith.constant 2.49999952 : f32
    %561 = vector.broadcast %cst_194 : f32 to vector<4x256xf32>
    %562 = arith.mulf %560, %561 : vector<4x256xf32>
    %563 = arith.mulf %562, %454 : vector<4x256xf32>
    %564 = arith.addf %558, %563 : vector<4x256xf32>
    %cst_195 = arith.constant -2.200000e+00 : f32
    %565 = vector.broadcast %cst_195 : f32 to vector<4x256xf32>
    %566 = arith.subf %377, %565 : vector<4x256xf32>
    %cst_196 = arith.constant 1.24999988 : f32
    %567 = vector.broadcast %cst_196 : f32 to vector<4x256xf32>
    %568 = arith.mulf %566, %567 : vector<4x256xf32>
    %569 = arith.mulf %568, %465 : vector<4x256xf32>
    %cst_197 = arith.constant -1.000000e+00 : f32
    %570 = vector.broadcast %cst_197 : f32 to vector<4x256xf32>
    %571 = arith.subf %570, %377 : vector<4x256xf32>
    %cst_198 = arith.constant 1.25000012 : f32
    %572 = vector.broadcast %cst_198 : f32 to vector<4x256xf32>
    %573 = arith.mulf %571, %572 : vector<4x256xf32>
    %574 = arith.mulf %573, %476 : vector<4x256xf32>
    %575 = arith.addf %569, %574 : vector<4x256xf32>
    %cst_199 = arith.constant -1.800000e+00 : f32
    %576 = vector.broadcast %cst_199 : f32 to vector<4x256xf32>
    %577 = arith.subf %377, %576 : vector<4x256xf32>
    %cst_200 = arith.constant 1.25000012 : f32
    %578 = vector.broadcast %cst_200 : f32 to vector<4x256xf32>
    %579 = arith.mulf %577, %578 : vector<4x256xf32>
    %580 = arith.mulf %579, %476 : vector<4x256xf32>
    %cst_201 = arith.constant -6.000000e-01 : f32
    %581 = vector.broadcast %cst_201 : f32 to vector<4x256xf32>
    %582 = arith.subf %581, %377 : vector<4x256xf32>
    %cst_202 = arith.constant 1.25000012 : f32
    %583 = vector.broadcast %cst_202 : f32 to vector<4x256xf32>
    %584 = arith.mulf %582, %583 : vector<4x256xf32>
    %585 = arith.mulf %584, %487 : vector<4x256xf32>
    %586 = arith.addf %580, %585 : vector<4x256xf32>
    %cst_203 = arith.constant -1.400000e+00 : f32
    %587 = vector.broadcast %cst_203 : f32 to vector<4x256xf32>
    %588 = arith.subf %377, %587 : vector<4x256xf32>
    %cst_204 = arith.constant 1.25000012 : f32
    %589 = vector.broadcast %cst_204 : f32 to vector<4x256xf32>
    %590 = arith.mulf %588, %589 : vector<4x256xf32>
    %591 = arith.mulf %590, %487 : vector<4x256xf32>
    %cst_205 = arith.constant -0.200000018 : f32
    %592 = vector.broadcast %cst_205 : f32 to vector<4x256xf32>
    %593 = arith.subf %592, %377 : vector<4x256xf32>
    %cst_206 = arith.constant 1.250000e+00 : f32
    %594 = vector.broadcast %cst_206 : f32 to vector<4x256xf32>
    %595 = arith.mulf %593, %594 : vector<4x256xf32>
    %596 = arith.mulf %595, %498 : vector<4x256xf32>
    %597 = arith.addf %591, %596 : vector<4x256xf32>
    %cst_207 = arith.constant -1.000000e+00 : f32
    %598 = vector.broadcast %cst_207 : f32 to vector<4x256xf32>
    %599 = arith.subf %377, %598 : vector<4x256xf32>
    %cst_208 = arith.constant 1.250000e+00 : f32
    %600 = vector.broadcast %cst_208 : f32 to vector<4x256xf32>
    %601 = arith.mulf %599, %600 : vector<4x256xf32>
    %602 = arith.mulf %601, %498 : vector<4x256xf32>
    %cst_209 = arith.constant 0.200000033 : f32
    %603 = vector.broadcast %cst_209 : f32 to vector<4x256xf32>
    %604 = arith.subf %603, %377 : vector<4x256xf32>
    %cst_210 = arith.constant 1.24999988 : f32
    %605 = vector.broadcast %cst_210 : f32 to vector<4x256xf32>
    %606 = arith.mulf %604, %605 : vector<4x256xf32>
    %607 = arith.mulf %606, %509 : vector<4x256xf32>
    %608 = arith.addf %602, %607 : vector<4x256xf32>
    %cst_211 = arith.constant -6.000000e-01 : f32
    %609 = vector.broadcast %cst_211 : f32 to vector<4x256xf32>
    %610 = arith.subf %377, %609 : vector<4x256xf32>
    %cst_212 = arith.constant 1.24999988 : f32
    %611 = vector.broadcast %cst_212 : f32 to vector<4x256xf32>
    %612 = arith.mulf %610, %611 : vector<4x256xf32>
    %613 = arith.mulf %612, %509 : vector<4x256xf32>
    %cst_213 = arith.constant 6.000000e-01 : f32
    %614 = vector.broadcast %cst_213 : f32 to vector<4x256xf32>
    %615 = arith.subf %614, %377 : vector<4x256xf32>
    %cst_214 = arith.constant 1.24999988 : f32
    %616 = vector.broadcast %cst_214 : f32 to vector<4x256xf32>
    %617 = arith.mulf %615, %616 : vector<4x256xf32>
    %618 = arith.mulf %617, %520 : vector<4x256xf32>
    %619 = arith.addf %613, %618 : vector<4x256xf32>
    %cst_215 = arith.constant -0.200000018 : f32
    %620 = vector.broadcast %cst_215 : f32 to vector<4x256xf32>
    %621 = arith.subf %377, %620 : vector<4x256xf32>
    %cst_216 = arith.constant 1.24999988 : f32
    %622 = vector.broadcast %cst_216 : f32 to vector<4x256xf32>
    %623 = arith.mulf %621, %622 : vector<4x256xf32>
    %624 = arith.mulf %623, %520 : vector<4x256xf32>
    %cst_217 = arith.constant 1.000000e+00 : f32
    %625 = vector.broadcast %cst_217 : f32 to vector<4x256xf32>
    %626 = arith.subf %625, %377 : vector<4x256xf32>
    %cst_218 = arith.constant 1.250000e+00 : f32
    %627 = vector.broadcast %cst_218 : f32 to vector<4x256xf32>
    %628 = arith.mulf %626, %627 : vector<4x256xf32>
    %629 = arith.mulf %628, %531 : vector<4x256xf32>
    %630 = arith.addf %624, %629 : vector<4x256xf32>
    %cst_219 = arith.constant 0.200000033 : f32
    %631 = vector.broadcast %cst_219 : f32 to vector<4x256xf32>
    %632 = arith.subf %377, %631 : vector<4x256xf32>
    %cst_220 = arith.constant 1.250000e+00 : f32
    %633 = vector.broadcast %cst_220 : f32 to vector<4x256xf32>
    %634 = arith.mulf %632, %633 : vector<4x256xf32>
    %635 = arith.mulf %634, %531 : vector<4x256xf32>
    %cst_221 = arith.constant 1.400000e+00 : f32
    %636 = vector.broadcast %cst_221 : f32 to vector<4x256xf32>
    %637 = arith.subf %636, %377 : vector<4x256xf32>
    %cst_222 = arith.constant 1.25000012 : f32
    %638 = vector.broadcast %cst_222 : f32 to vector<4x256xf32>
    %639 = arith.mulf %637, %638 : vector<4x256xf32>
    %640 = arith.mulf %639, %542 : vector<4x256xf32>
    %641 = arith.addf %635, %640 : vector<4x256xf32>
    %cst_223 = arith.constant 6.000000e-01 : f32
    %642 = vector.broadcast %cst_223 : f32 to vector<4x256xf32>
    %643 = arith.subf %377, %642 : vector<4x256xf32>
    %cst_224 = arith.constant 1.25000012 : f32
    %644 = vector.broadcast %cst_224 : f32 to vector<4x256xf32>
    %645 = arith.mulf %643, %644 : vector<4x256xf32>
    %646 = arith.mulf %645, %542 : vector<4x256xf32>
    %cst_225 = arith.constant 1.800000e+00 : f32
    %647 = vector.broadcast %cst_225 : f32 to vector<4x256xf32>
    %648 = arith.subf %647, %377 : vector<4x256xf32>
    %cst_226 = arith.constant 1.25000012 : f32
    %649 = vector.broadcast %cst_226 : f32 to vector<4x256xf32>
    %650 = arith.mulf %648, %649 : vector<4x256xf32>
    %651 = arith.mulf %650, %553 : vector<4x256xf32>
    %652 = arith.addf %646, %651 : vector<4x256xf32>
    %cst_227 = arith.constant 1.000000e+00 : f32
    %653 = vector.broadcast %cst_227 : f32 to vector<4x256xf32>
    %654 = arith.subf %377, %653 : vector<4x256xf32>
    %cst_228 = arith.constant 1.25000012 : f32
    %655 = vector.broadcast %cst_228 : f32 to vector<4x256xf32>
    %656 = arith.mulf %654, %655 : vector<4x256xf32>
    %657 = arith.mulf %656, %553 : vector<4x256xf32>
    %cst_229 = arith.constant 2.200000e+00 : f32
    %658 = vector.broadcast %cst_229 : f32 to vector<4x256xf32>
    %659 = arith.subf %658, %377 : vector<4x256xf32>
    %cst_230 = arith.constant 1.24999988 : f32
    %660 = vector.broadcast %cst_230 : f32 to vector<4x256xf32>
    %661 = arith.mulf %659, %660 : vector<4x256xf32>
    %662 = arith.mulf %661, %564 : vector<4x256xf32>
    %663 = arith.addf %657, %662 : vector<4x256xf32>
    %cst_231 = arith.constant -2.200000e+00 : f32
    %664 = vector.broadcast %cst_231 : f32 to vector<4x256xf32>
    %665 = arith.subf %377, %664 : vector<4x256xf32>
    %cst_232 = arith.constant 0.833333313 : f32
    %666 = vector.broadcast %cst_232 : f32 to vector<4x256xf32>
    %667 = arith.mulf %665, %666 : vector<4x256xf32>
    %668 = arith.mulf %667, %575 : vector<4x256xf32>
    %cst_233 = arith.constant -6.000000e-01 : f32
    %669 = vector.broadcast %cst_233 : f32 to vector<4x256xf32>
    %670 = arith.subf %669, %377 : vector<4x256xf32>
    %cst_234 = arith.constant 0.833333373 : f32
    %671 = vector.broadcast %cst_234 : f32 to vector<4x256xf32>
    %672 = arith.mulf %670, %671 : vector<4x256xf32>
    %673 = arith.mulf %672, %586 : vector<4x256xf32>
    %674 = arith.addf %668, %673 : vector<4x256xf32>
    %cst_235 = arith.constant -1.800000e+00 : f32
    %675 = vector.broadcast %cst_235 : f32 to vector<4x256xf32>
    %676 = arith.subf %377, %675 : vector<4x256xf32>
    %cst_236 = arith.constant 0.833333373 : f32
    %677 = vector.broadcast %cst_236 : f32 to vector<4x256xf32>
    %678 = arith.mulf %676, %677 : vector<4x256xf32>
    %679 = arith.mulf %678, %586 : vector<4x256xf32>
    %cst_237 = arith.constant -0.200000018 : f32
    %680 = vector.broadcast %cst_237 : f32 to vector<4x256xf32>
    %681 = arith.subf %680, %377 : vector<4x256xf32>
    %cst_238 = arith.constant 0.833333373 : f32
    %682 = vector.broadcast %cst_238 : f32 to vector<4x256xf32>
    %683 = arith.mulf %681, %682 : vector<4x256xf32>
    %684 = arith.mulf %683, %597 : vector<4x256xf32>
    %685 = arith.addf %679, %684 : vector<4x256xf32>
    %cst_239 = arith.constant -1.400000e+00 : f32
    %686 = vector.broadcast %cst_239 : f32 to vector<4x256xf32>
    %687 = arith.subf %377, %686 : vector<4x256xf32>
    %cst_240 = arith.constant 0.833333373 : f32
    %688 = vector.broadcast %cst_240 : f32 to vector<4x256xf32>
    %689 = arith.mulf %687, %688 : vector<4x256xf32>
    %690 = arith.mulf %689, %597 : vector<4x256xf32>
    %cst_241 = arith.constant 0.200000033 : f32
    %691 = vector.broadcast %cst_241 : f32 to vector<4x256xf32>
    %692 = arith.subf %691, %377 : vector<4x256xf32>
    %cst_242 = arith.constant 0.833333313 : f32
    %693 = vector.broadcast %cst_242 : f32 to vector<4x256xf32>
    %694 = arith.mulf %692, %693 : vector<4x256xf32>
    %695 = arith.mulf %694, %608 : vector<4x256xf32>
    %696 = arith.addf %690, %695 : vector<4x256xf32>
    %cst_243 = arith.constant -1.000000e+00 : f32
    %697 = vector.broadcast %cst_243 : f32 to vector<4x256xf32>
    %698 = arith.subf %377, %697 : vector<4x256xf32>
    %cst_244 = arith.constant 0.833333313 : f32
    %699 = vector.broadcast %cst_244 : f32 to vector<4x256xf32>
    %700 = arith.mulf %698, %699 : vector<4x256xf32>
    %701 = arith.mulf %700, %608 : vector<4x256xf32>
    %cst_245 = arith.constant 6.000000e-01 : f32
    %702 = vector.broadcast %cst_245 : f32 to vector<4x256xf32>
    %703 = arith.subf %702, %377 : vector<4x256xf32>
    %cst_246 = arith.constant 0.833333313 : f32
    %704 = vector.broadcast %cst_246 : f32 to vector<4x256xf32>
    %705 = arith.mulf %703, %704 : vector<4x256xf32>
    %706 = arith.mulf %705, %619 : vector<4x256xf32>
    %707 = arith.addf %701, %706 : vector<4x256xf32>
    %cst_247 = arith.constant -6.000000e-01 : f32
    %708 = vector.broadcast %cst_247 : f32 to vector<4x256xf32>
    %709 = arith.subf %377, %708 : vector<4x256xf32>
    %cst_248 = arith.constant 0.833333313 : f32
    %710 = vector.broadcast %cst_248 : f32 to vector<4x256xf32>
    %711 = arith.mulf %709, %710 : vector<4x256xf32>
    %712 = arith.mulf %711, %619 : vector<4x256xf32>
    %cst_249 = arith.constant 1.000000e+00 : f32
    %713 = vector.broadcast %cst_249 : f32 to vector<4x256xf32>
    %714 = arith.subf %713, %377 : vector<4x256xf32>
    %cst_250 = arith.constant 0.833333313 : f32
    %715 = vector.broadcast %cst_250 : f32 to vector<4x256xf32>
    %716 = arith.mulf %714, %715 : vector<4x256xf32>
    %717 = arith.mulf %716, %630 : vector<4x256xf32>
    %718 = arith.addf %712, %717 : vector<4x256xf32>
    %cst_251 = arith.constant -0.200000018 : f32
    %719 = vector.broadcast %cst_251 : f32 to vector<4x256xf32>
    %720 = arith.subf %377, %719 : vector<4x256xf32>
    %cst_252 = arith.constant 0.833333313 : f32
    %721 = vector.broadcast %cst_252 : f32 to vector<4x256xf32>
    %722 = arith.mulf %720, %721 : vector<4x256xf32>
    %723 = arith.mulf %722, %630 : vector<4x256xf32>
    %cst_253 = arith.constant 1.400000e+00 : f32
    %724 = vector.broadcast %cst_253 : f32 to vector<4x256xf32>
    %725 = arith.subf %724, %377 : vector<4x256xf32>
    %cst_254 = arith.constant 0.833333373 : f32
    %726 = vector.broadcast %cst_254 : f32 to vector<4x256xf32>
    %727 = arith.mulf %725, %726 : vector<4x256xf32>
    %728 = arith.mulf %727, %641 : vector<4x256xf32>
    %729 = arith.addf %723, %728 : vector<4x256xf32>
    %cst_255 = arith.constant 0.200000033 : f32
    %730 = vector.broadcast %cst_255 : f32 to vector<4x256xf32>
    %731 = arith.subf %377, %730 : vector<4x256xf32>
    %cst_256 = arith.constant 0.833333373 : f32
    %732 = vector.broadcast %cst_256 : f32 to vector<4x256xf32>
    %733 = arith.mulf %731, %732 : vector<4x256xf32>
    %734 = arith.mulf %733, %641 : vector<4x256xf32>
    %cst_257 = arith.constant 1.800000e+00 : f32
    %735 = vector.broadcast %cst_257 : f32 to vector<4x256xf32>
    %736 = arith.subf %735, %377 : vector<4x256xf32>
    %cst_258 = arith.constant 0.833333373 : f32
    %737 = vector.broadcast %cst_258 : f32 to vector<4x256xf32>
    %738 = arith.mulf %736, %737 : vector<4x256xf32>
    %739 = arith.mulf %738, %652 : vector<4x256xf32>
    %740 = arith.addf %734, %739 : vector<4x256xf32>
    %cst_259 = arith.constant 6.000000e-01 : f32
    %741 = vector.broadcast %cst_259 : f32 to vector<4x256xf32>
    %742 = arith.subf %377, %741 : vector<4x256xf32>
    %cst_260 = arith.constant 0.833333373 : f32
    %743 = vector.broadcast %cst_260 : f32 to vector<4x256xf32>
    %744 = arith.mulf %742, %743 : vector<4x256xf32>
    %745 = arith.mulf %744, %652 : vector<4x256xf32>
    %cst_261 = arith.constant 2.200000e+00 : f32
    %746 = vector.broadcast %cst_261 : f32 to vector<4x256xf32>
    %747 = arith.subf %746, %377 : vector<4x256xf32>
    %cst_262 = arith.constant 0.833333313 : f32
    %748 = vector.broadcast %cst_262 : f32 to vector<4x256xf32>
    %749 = arith.mulf %747, %748 : vector<4x256xf32>
    %750 = arith.mulf %749, %663 : vector<4x256xf32>
    %751 = arith.addf %745, %750 : vector<4x256xf32>
    %752 = tpu.concatenate %674, %685, %696, %707, %718, %729, %740, %751 in 0 : vector<4x256xf32>, vector<4x256xf32>, vector<4x256xf32>, vector<4x256xf32>, vector<4x256xf32>, vector<4x256xf32>, vector<4x256xf32>, vector<4x256xf32> -> vector<32x256xf32>
    %c0_263 = arith.constant 0 : index
    %c0_264 = arith.constant 0 : index
    %753 = vector.load %arg3[%c0_263, %c0_264] : memref<2x32xf32, #tpu.memory_space<vmem>>, vector<2x32xf32>
    %cst_265 = arith.constant dense<0.000000e+00> : vector<2x256xf32>
    %754 = tpu.matmul %753, %752, %cst_265 {dimension_numbers = #tpu.dot_dimension_numbers<[1], [0], [0], [1], [0, 0, 1, 1], [], []>} : vector<2x32xf32>, vector<32x256xf32>, vector<2x256xf32> -> vector<2x256xf32>
    %c0_266 = arith.constant 0 : index
    %c0_267 = arith.constant 0 : index
    %755 = vector.load %arg4[%c0_266, %c0_267] : memref<2x256xf32, #tpu.memory_space<vmem>>, vector<2x256xf32>
    tpu.vector_store %arg4[%c0_266, %c0_267], %754 {strides = array<i32>} : memref<2x256xf32, #tpu.memory_space<vmem>>, vector<2x256xf32>,
    return
  }
  func.func @transform_0(%arg0: i32) -> (i32, i32) {
    %c0_i32 = arith.constant 0 : i32
    %c0_i32_0 = arith.constant 0 : i32
    return %c0_i32, %arg0 : i32, i32
  }
  func.func @transform_1(%arg0: i32) -> (i32, i32) {
    %c0_i32 = arith.constant 0 : i32
    %c0_i32_0 = arith.constant 0 : i32
    %c0_i32_1 = arith.constant 0 : i32
    return %c0_i32, %c0_i32_0 : i32, i32
  }
  func.func @transform_2(%arg0: i32) -> (i32, i32) {
    %c0_i32 = arith.constant 0 : i32
    %c0_i32_0 = arith.constant 0 : i32
    %c0_i32_1 = arith.constant 0 : i32
    return %c0_i32, %c0_i32_0 : i32, i32
  }
  func.func @transform_3(%arg0: i32) -> (i32, i32) {
    %c0_i32 = arith.constant 0 : i32
    %c0_i32_0 = arith.constant 0 : i32
    return %c0_i32, %arg0 : i32, i32
  }
}

</mosaic_0001>

<bundles_post_ra>
// kernel: forward.1
= control target key start
LH: loop header
LB: loop body
LE: loop exit
PB: predicated region body
PF: predicated region fallthrough
CT: control target
= control target key end

     0   :  { %s1247_s12 = smov 0   ;;  %s1669_s0 = inlined_call_operand.vmem [shape: f32[3,512], index: 0, kind: input, shape index: {}]   ;;  %s1670_s1 = inlined_call_operand.vmem [shape: f32[4,24], index: 1, kind: input, shape index: {}]   ;;  %s1671_s2 = inlined_call_operand.vmem [shape: f32[2,32], index: 2, kind: input, shape index: {}]   ;;  %s1672_s3 = inlined_call_operand.vmem [shape: f32[2,512], index: 3, kind: output, shape index: {}]  }
   0x1 LB: > { %s1120_s13 = sadd.s32 4294967295, %s1224_s12   ;;  %p1124_p0 = scmp.ge.s32.totalorder %s1224_s12, 1  ;;  %s1224_s12 = sphi %s1247_s12, %s13_s12  }
   0x2   : > { %p138_p1 = scmp.lt.s32.totalorder %s1224_s12, 3 }
   0x4   : > { %p139_p2 = pnand %p1124_p0, %p138_p1 }
   0x5   : > { %s1125_s14 = sshll.u32 (!%p139_p2), %s1120_s13, 1  ;;  %v1226_v0 = vmov (!%p139_p2), 0.0  }
   0x6   : > { %142 = sbr.rel (%p139_p2) target bundleno = 625 (0x271), region = 32  ;;  %p163_p3 = scmp.lt.s32.totalorder (!%p139_p2), %s1125_s14, 3  ;;  %517 = vmatprep.mubr.f32.mxu0 (!%p139_p2), %v1226_v0  ;;  %1045 = vmatprep.mubr.f32.mxu1 (!%p139_p2), %v1226_v0 }
   0xd   : > { %s1676_s14 = smov (!%p163_p3, %s1125_s14), 3 }
   0xe   : > { %s1126_s15 = sshll.u32 %s1676_s14, 2  ;;  %s1128_s23 = sshll.u32 %s1676_s14, 1 }
   0xf   : > { %s166_s18 = scalar_lea.vmem %s1669_s0, %s1126_s15  ;;  %s172_s26 = scalar_lea.vmem %s1672_s3, %s1128_s23 }
  0x10   : > { %v1263_v1 = vld [vmem:[%s166_s18] sm:$0x77] }
  0x11   : > { %vm175_vm0 = vcmp.ge.f32.partialorder %v1263_v1, -2.2  ;;  %vm176_vm1 = vcmp.lt.f32.partialorder %v1263_v1, -1.8  ;;  %vm180_vm2 = vcmp.ge.f32.partialorder %v1263_v1, -1.8 }
  0x12   : > { %vm177_vm3 = vmand %vm175_vm0, %vm176_vm1  ;;  %vm181_vm4 = vcmp.lt.f32.partialorder %v1263_v1, -1.4  ;;  %vm185_vm5 = vcmp.ge.f32.partialorder %v1263_v1, -1.4  ;;  %vm186_vm6 = vcmp.lt.f32.partialorder %v1263_v1, -1.0  ;;  %vm190_vm7 = vcmp.ge.f32.partialorder %v1263_v1, -1.0 }
  0x13   : > { %v1129_v2 = vsel %vm177_vm3, 1.0, %v1226_v0  ;;  %vm182_vm8 = vmand %vm180_vm2, %vm181_vm4  ;;  %vm191_vm9 = vcmp.lt.f32.partialorder %v1263_v1, -0.6  ;;  %vm195_vm10 = vcmp.ge.f32.partialorder %v1263_v1, -0.6  ;;  %vm211_vm11 = vcmp.lt.f32.partialorder %v1263_v1, 1.0 }
  0x14   : > { %v1130_v3 = vsel %vm182_vm8, 1.0, %v1226_v0  ;;  %vm187_vm12 = vmand %vm185_vm5, %vm186_vm6  ;;  %vm196_vm13 = vcmp.lt.f32.partialorder %v1263_v1, -0.20000002  ;;  %vm200_vm14 = vcmp.ge.f32.partialorder %v1263_v1, -0.20000002  ;;  %vm215_vm15 = vcmp.ge.f32.partialorder %v1263_v1, 1.0 }
  0x15   : > { %v1131_v4 = vsel %vm187_vm12, 1.0, %v1226_v0  ;;  %vm192_vm0 = vmand %vm190_vm7, %vm191_vm9  ;;  %vm201_vm1 = vcmp.lt.f32.partialorder %v1263_v1, 0.20000003  ;;  %vm205_vm2 = vcmp.ge.f32.partialorder %v1263_v1, 0.20000003  ;;  %v240_v5 = vsub.f32 -1.0, %v1263_v1 }
  0x16   : > { %v1132_v6 = vsel %vm192_vm0, 1.0, %v1226_v0  ;;  %vm197_vm3 = vmand %vm195_vm10, %vm196_vm13  ;;  %vm206_vm4 = vcmp.lt.f32.partialorder %v1263_v1, 0.6  ;;  %vm210_vm5 = vcmp.ge.f32.partialorder %v1263_v1, 0.6  ;;  %v1288_v7 = vadd.f32 1.0, %v1263_v1 }
  0x17   : > { %v1133_v8 = vsel %vm197_vm3, 1.0, %v1226_v0  ;;  %vm202_vm6 = vmand %vm200_vm14, %vm201_vm1  ;;  %vm216_vm7 = vcmp.lt.f32.partialorder %v1263_v1, 1.4  ;;  %v1293_v9 = vadd.f32 2.2, %v1263_v1  ;;  %v1296_v10 = vsub.f32 1.0, %v1263_v1 }
  0x18   : > { %v1134_v11 = vsel %vm202_vm6, 1.0, %v1226_v0  ;;  %vm207_vm8 = vmand %vm205_vm2, %vm206_vm4  ;;  %v233_v12 = vsub.f32 -1.4, %v1263_v1  ;;  %v1301_v13 = vadd.f32 1.8, %v1263_v1  ;;  %v1304_v14 = vmul.f32 1.25, %v1288_v7 }
  0x19   : > { %v1135_v15 = vsel %vm207_vm8, 1.0, %v1226_v0  ;;  %vm212_vm9 = vmand %vm210_vm5, %vm211_vm11  ;;  %v231_v16 = vmul.f32 2.4999995, %v1293_v9  ;;  %v241_v17 = vmul.f32 2.5000002, %v240_v5  ;;  %v1313_v18 = vmul.f32 1.25, %v1296_v10 }
  0x1a   : > { %v1136_v19 = vsel %vm212_vm9, 1.0, %v1226_v0  ;;  %vm217_vm10 = vmand %vm215_vm15, %vm216_vm7  ;;  %v234_v20 = vmul.f32 2.5000002, %v233_v12  ;;  %v238_v21 = vmul.f32 2.5000002, %v1301_v13  ;;  %v1320_v22 = vadd.f32 -1.0, %v1263_v1 }
  0x1b   : > { %v1323_v23 = vsel %vm217_vm10, 1.0, %v1226_v0  ;;  %v232_v24 = vmul.f32 %v1129_v2, %v231_v16  ;;  %v242_v25 = vmul.f32 %v1131_v4, %v241_v17  ;;  %v1326_v26 = vadd.f32 1.4, %v1263_v1 }
  0x1c   : > { %v235_v27 = vmul.f32 %v1130_v3, %v234_v20  ;;  %v239_v28 = vmul.f32 %v1130_v3, %v238_v21  ;;  %v1329_v29 = vsub.f32 -0.6, %v1263_v1  ;;  %v252_v30 = vmul.f32 2.5000002, %v1288_v7 }
  0x1d   : > { %v245_v31 = vmul.f32 2.5000002, %v1326_v26  ;;  %v1334_v32 = vsub.f32 -0.20000002, %v1263_v1  ;;  %v1337_v33 = vadd.f32 0.6, %v1263_v1 }
  0x1e   : > { %v236_v34 = vadd.f32 %v235_v27, %v232_v24  ;;  %v243_v35 = vadd.f32 %v242_v25, %v239_v28  ;;  %v248_v36 = vmul.f32 2.5000002, %v1329_v29  ;;  %v253_v37 = vmul.f32 %v1132_v6, %v252_v30 }
  0x1f   : > { %v246_v38 = vmul.f32 %v1131_v4, %v245_v31  ;;  %v255_v39 = vmul.f32 2.5, %v1334_v32  ;;  %v259_v40 = vmul.f32 2.5, %v1337_v33  ;;  %v1343_v41 = vsub.f32 0.20000003, %v1263_v1 }
  0x20   : > { %v249_v42 = vmul.f32 %v1132_v6, %v248_v36  ;;  %v1346_v43 = vadd.f32 0.20000002, %v1263_v1  ;;  %v1349_v44 = vsub.f32 0.6, %v1263_v1  ;;  %v1352_v45 = vadd.f32 -0.20000003, %v1263_v1 }
  0x21   : > { %v256_v46 = vmul.f32 %v1133_v8, %v255_v39  ;;  %v260_v47 = vmul.f32 %v1133_v8, %v259_v40  ;;  %v262_v48 = vmul.f32 2.4999998, %v1343_v41  ;;  %v276_v49 = vmul.f32 2.5000002, %v1296_v10 }
  0x22   : > { %v250_v50 = vadd.f32 %v249_v42, %v246_v38  ;;  %v266_v51 = vmul.f32 2.4999998, %v1346_v43  ;;  %v269_v52 = vmul.f32 2.5, %v1349_v44  ;;  %v273_v53 = vmul.f32 2.5, %v1352_v45 }
  0x23   : > { %v257_v54 = vadd.f32 %v256_v46, %v253_v37  ;;  %v263_v55 = vmul.f32 %v1134_v11, %v262_v48  ;;  %v277_v56 = vmul.f32 %v1136_v19, %v276_v49  ;;  %v1360_v57 = vadd.f32 -0.6, %v1263_v1 }
  0x24   : > { %v267_v58 = vmul.f32 %v1134_v11, %v266_v51  ;;  %v270_v59 = vmul.f32 %v1135_v15, %v269_v52  ;;  %v274_v60 = vmul.f32 %v1135_v15, %v273_v53  ;;  %v1363_v61 = vsub.f32 1.4, %v1263_v1 }
  0x25   : > { %v264_v62 = vadd.f32 %v263_v55, %v260_v47  ;;  %v280_v63 = vmul.f32 2.5000002, %v1360_v57  ;;  %v300_v2 = vmul.f32 1.2499999, %v1293_v9  ;;  %v302_v3 = vmul.f32 1.2500001, %v240_v5 }
  0x26   : > { %v271_v4 = vadd.f32 %v270_v59, %v267_v58  ;;  %v278_v6 = vadd.f32 %v277_v56, %v274_v60  ;;  %v283_v8 = vmul.f32 2.5000002, %v1363_v61  ;;  %v305_v12 = vmul.f32 1.2500001, %v1301_v13 }
  0x27   : > { %v281_v11 = vmul.f32 %v1136_v19, %v280_v63  ;;  %v301_v16 = vmul.f32 %v300_v2, %v236_v34  ;;  %v303_v15 = vmul.f32 %v302_v3, %v243_v35  ;;  %v307_v17 = vmul.f32 1.2500001, %v1329_v29 }
  0x28   : > { %v284_v20 = vmul.f32 %v1323_v23, %v283_v8  ;;  %v306_v21 = vmul.f32 %v305_v12, %v243_v35  ;;  %v310_v24 = vmul.f32 1.2500001, %v1326_v26  ;;  %v312_v25 = vmul.f32 1.25, %v1334_v32 }
  0x29   : > { %v304_v27 = vadd.f32 %v303_v15, %v301_v16  ;;  %v308_v5 = vmul.f32 %v307_v17, %v250_v50  ;;  %v316_v28 = vmul.f32 %v1304_v14, %v257_v54  ;;  %v317_v30 = vmul.f32 1.2499999, %v1343_v41 }
  0x2a   : > { %v1377_v31 = vadd.f32 %v284_v20, %v281_v11  ;;  %v311_v19 = vmul.f32 %v310_v24, %v250_v50  ;;  %v313_v34 = vmul.f32 %v312_v25, %v257_v54  ;;  %v320_v36 = vmul.f32 1.2499999, %v1337_v33 }
  0x2b   : > { %v309_v37 = vadd.f32 %v308_v5, %v306_v21  ;;  %v318_v38 = vmul.f32 %v317_v30, %v264_v62  ;;  %v322_v35 = vmul.f32 1.2499999, %v1349_v44  ;;  %v325_v39 = vmul.f32 1.2499999, %v1346_v43 }
  0x2c   : > { %v314_v40 = vadd.f32 %v313_v34, %v311_v19  ;;  %v321_v42 = vmul.f32 %v320_v36, %v264_v62  ;;  %v328_v46 = vmul.f32 %v1313_v18, %v278_v6  ;;  %v330_v14 = vmul.f32 1.25, %v1352_v45 }
  0x2d   : > { %v319_v47 = vadd.f32 %v318_v38, %v316_v28  ;;  %v323_v48 = vmul.f32 %v322_v35, %v271_v4  ;;  %v326_v49 = vmul.f32 %v325_v39, %v271_v4  ;;  %v332_v50 = vmul.f32 1.2500001, %v1363_v61 }
  0x2e   : > { %vm427_vm11 = vcmask 1042432   ;;  %v331_v51 = vmul.f32 %v330_v14, %v278_v6  ;;  %v345_v52 = vmul.f32 0.8333333, %v1293_v9  ;;  %v347_v53 = vmul.f32 0.8333334, %v1329_v29 }
  0x2f   : > { %v350_v54 = vmul.f32 0.8333334, %v1301_v13  ;;  %vm430_vm12 = vcmask 1045504   ;;  %v324_v55 = vadd.f32 %v323_v48, %v321_v42  ;;  %v329_v56 = vadd.f32 %v328_v46, %v326_v49 }
  0x30   : > { %v333_v18 = vmul.f32 %v332_v50, %v1377_v31  ;;  %v352_v58 = vmul.f32 0.8333334, %v1334_v32  ;;  %vm433_vm13 = vcmask 1040384   ;;  %v346_v59 = vmul.f32 %v345_v52, %v304_v27 }
  0x31   : > { %v348_v60 = vmul.f32 %v347_v53, %v309_v37  ;;  %v351_v62 = vmul.f32 %v350_v54, %v309_v37  ;;  %v355_v63 = vmul.f32 0.8333334, %v1326_v26  ;;  %vm436_vm14 = vcmask 1043456  }
  0x32   : > { %v1391_v2 = vadd.f32 %v333_v18, %v331_v51  ;;  %v353_v9 = vmul.f32 %v352_v58, %v314_v40  ;;  %v357_v29 = vmul.f32 0.8333333, %v1343_v41  ;;  %v360_v13 = vmul.f32 0.8333333, %v1288_v7 }
  0x33   : > { %vm439_vm15 = vcmask 1046528   ;;  %v349_v3 = vadd.f32 %v348_v60, %v346_v59  ;;  %v356_v4 = vmul.f32 %v355_v63, %v314_v40  ;;  %v362_v6 = vmul.f32 0.8333333, %v1349_v44 }
  0x34   : > { %v365_v32 = vmul.f32 0.8333333, %v1337_v33  ;;  %v354_v8 = vadd.f32 %v353_v9, %v351_v62  ;;  %v358_v12 = vmul.f32 %v357_v29, %v319_v47  ;;  %v361_v11 = vmul.f32 %v360_v13, %v319_v47 }
  0x35   : > { %v367_v26 = vmul.f32 0.8333333, %v1296_v10  ;;  %v363_v16 = vmul.f32 %v362_v6, %v324_v55  ;;  %v370_v17 = vmul.f32 0.8333333, %v1346_v43  ;;  %v372_v41 = vmul.f32 0.8333334, %v1363_v61 }
  0x36   : > { %v366_v15 = vmul.f32 %v365_v32, %v324_v55  ;;  %v359_v20 = vadd.f32 %v358_v12, %v356_v4  ;;  %v386_v21 = vcombine.high %v349_v3, %v349_v3  ;;  %v389_v24 = vcombine.high %v354_v8, %v354_v8 }
  0x37   : > { %v368_v7 = vmul.f32 %v367_v26, %v329_v56  ;;  %v364_v25 = vadd.f32 %v363_v16, %v361_v11  ;;  %v371_v27 = vmul.f32 %v370_v17, %v329_v56  ;;  %v373_v44 = vmul.f32 %v372_v41, %v1391_v2 }
  0x38   : > { %v390_v33 = vrot.slane %v354_v8, 5  ;;  %v391_v28 = vrot.slane %v389_v24, 5  ;;  %v395_v30 = vcombine.high %v359_v20, %v359_v20  ;;  %v396_v19 = vrot.slane %v359_v20, 2 }
  0x39   : > { %v369_v5 = vadd.f32 %v368_v7, %v366_v15  ;;  %v1401_v10 = vadd.f32 %v373_v44, %v371_v27  ;;  %v401_v34 = vcombine.high %v364_v25, %v364_v25  ;;  %v402_v36 = vrot.slane %v364_v25, 7 }
  0x3a   : > { %v428_v43 = vsel %vm427_vm11, %v349_v3, %v390_v33  ;;  %v397_v61 = vrot.slane %v395_v30, 2  ;;  %v429_v37 = vsel %vm427_vm11, %v386_v21, %v391_v28  ;;  %vm220_vm0 = vcmp.ge.f32.partialorder %v1263_v1, 1.4 }
  0x3b   : > { %v407_v38 = vcombine.low %v369_v5, %v369_v5  ;;  %v431_v35 = vsel %vm430_vm12, %v428_v43, %v396_v19  ;;  %v403_v39 = vrot.slane %v401_v34, 7  ;;  %v410_v40 = vcombine.high %v1401_v10, %v1401_v10 }
  0x3c   : > { %v411_v42 = vrot.slane %v1401_v10, 1  ;;  %v434_v46 = vsel %vm433_vm13, %v396_v19, %v402_v36  ;;  %v432_v14 = vsel %vm430_vm12, %v429_v37, %v397_v61  ;;  %vm221_vm1 = vcmp.lt.f32.partialorder %v1263_v1, 1.8 }
  0x3d   : > { %v437_v47 = vsel %vm436_vm14, %v434_v46, %v407_v38  ;;  %v412_v48 = vrot.slane %v410_v40, 1  ;;  %v435_v49 = vsel %vm433_vm13, %v397_v61, %v403_v39  ;;  %vm222_vm2 = vmand %vm220_vm0, %vm221_vm1  ;;  %vm225_vm3 = vcmp.ge.f32.partialorder %v1263_v1, 1.8 }
  0x3e   : > { %v440_v50 = vsel %vm439_vm15, %v437_v47, %v411_v42  ;;  %v438_v51 = vsel %vm436_vm14, %v435_v49, %v369_v5  ;;  %vm226_vm4 = vcmp.lt.f32.partialorder %v1263_v1, 2.2  ;;  %v287_v54 = vmul.f32 2.5000002, %v1320_v22 }
  0x3f   : > { %v1199_v52 = vpack.c.bf16 %v440_v50, %v431_v35  ;;  %v441_v53 = vsel %vm439_vm15, %v438_v51, %v412_v48  ;;  %vm227_vm5 = vmand %vm225_vm3, %vm226_vm4  ;;  %v289_v55 = vsub.f32 1.8, %v1263_v1  ;;  %v1149_v56 = vadd.f32 -1.4, %v1263_v1 }
  0x40   : > { %v1197_v18 = vpack.c.bf16 %v441_v53, %v432_v14  ;;  %v1138_v58 = vsel %vm222_vm2, 1.0, %v1226_v0  ;;  %v1139_v59 = vsel %vm227_vm5, 1.0, %v1226_v0  ;;  %v296_v60 = vsub.f32 2.2, %v1263_v1 }
  0x41   : > { %v288_v62 = vmul.f32 %v1323_v23, %v287_v54  ;;  %v290_v63 = vmul.f32 2.5000002, %v289_v55  ;;  %v294_v9 = vmul.f32 2.5000002, %v1149_v56  ;;  %v335_v29 = vmul.f32 1.2500001, %v1360_v57 }
  0x42   : > { %1198 = vmatprep.subr.bf16.mxu0 %v1197_v18  ;;  %v297_v13 = vmul.f32 2.4999995, %v296_v60  ;;  %v337_v6 = vmul.f32 1.2500001, %v289_v55  ;;  %v340_v32 = vmul.f32 1.2500001, %v1320_v22 }
  0x43   : > { %1200 = vmatpush1.bf16.msra.mxu0 %v1199_v52  ;;  %v291_v3 = vmul.f32 %v1138_v58, %v290_v63  ;;  %v295_v4 = vmul.f32 %v1138_v58, %v294_v9  ;;  %v342_v12 = vmul.f32 1.2499999, %v296_v60  ;;  %v336_v26 = vmul.f32 %v335_v29, %v1377_v31 }
  0x44   : > { %v298_v8 = vmul.f32 %v1139_v59, %v297_v13  ;;  %v375_v1 = vmul.f32 0.8333334, %v1352_v45  ;;  %v377_v17 = vmul.f32 0.8333334, %v289_v55  ;;  %v380_v41 = vmul.f32 0.8333334, %v1360_v57 }
  0x45   : > { %v292_v11 = vadd.f32 %v291_v3, %v288_v62  ;;  %v382_v7 = vmul.f32 0.8333333, %v296_v60  ;;  %vm442_vm6 = vcmask 1041408   ;;  %vm445_vm7 = vcmask 1044480  }
  0x46   : > { %v299_v23 = vadd.f32 %v298_v8, %v295_v4  ;;  %v376_v24 = vmul.f32 %v375_v1, %v1391_v2  ;;  %v448_v2 = vld [vmem:[%s1670_s1] sm:$0xf]  ;;  %vm449_vm8 = vcmask 195584  }
  0x47   : > { %v338_v16 = vmul.f32 %v337_v6, %v292_v11  ;;  %v341_v15 = vmul.f32 %v340_v32, %v292_v11 }
  0x48   : > { %v343_v20 = vmul.f32 %v342_v12, %v299_v23 }
  0x49   : > { %v339_v21 = vadd.f32 %v338_v16, %v336_v26 }
  0x4a   : > { %v344_v25 = vadd.f32 %v343_v20, %v341_v15 }
  0x4b   : > { %v378_v22 = vmul.f32 %v377_v17, %v339_v21  ;;  %v381_v27 = vmul.f32 %v380_v41, %v339_v21 }
  0x4c   : > { %v383_v44 = vmul.f32 %v382_v7, %v344_v25 }
  0x4d   : > { %v379_v33 = vadd.f32 %v378_v22, %v376_v24 }
  0x4e   : > { %v384_v5 = vadd.f32 %v383_v44, %v381_v27 }
  0x4f   : > { %v416_v31 = vcombine.high %v379_v33, %v379_v33  ;;  %v417_v45 = vrot.slane %v379_v33, 6 }
  0x50   : > { %v422_v28 = vcombine.high %v384_v5, %v384_v5  ;;  %v423_v30 = vrot.slane %v384_v5, 3 }
  0x51   : > { %v418_v19 = vrot.slane %v416_v31, 6  ;;  %v443_v10 = vsel %vm442_vm6, %v411_v42, %v417_v45 }
  0x52   : > { %v424_v57 = vrot.slane %v422_v28, 3  ;;  %v446_v36 = vsel %vm445_vm7, %v443_v10, %v423_v30 }
  0x53   : > { %v444_v34 = vsel %vm442_vm6, %v412_v48, %v418_v19 }
  0x54   : > { %v447_v43 = vsel %vm445_vm7, %v444_v34, %v424_v57 }
  0x55   : > { %457 = vmatprep.subr.mxu0 %v447_v43 }
  0x56   : > { %458 = vmatpush1.msra.mxu0 %v446_v36 }
  0x57   : > { %1150 = vmatmul.mubr.msk.f32.vlgmr.msra.gmra.mrb[0].mxu0 %vm449_vm8, %v448_v2 }
 0x12a   : > { %v1436_v61 = vpop.f32.mrb[0].mxu0 }
 0x12b   : > { %v1438_v37 = vpop.f32.mrb[1].mxu0  ;;  %vm524_vm9 = vcmp.ge.f32.partialorder %v1436_v61, -2.2  ;;  %vm526_vm10 = vcmp.lt.f32.partialorder %v1436_v61, -1.8  ;;  %v654_v56 = vsub.f32 -1.0, %v1436_v61 }
 0x12c   : > { %vm525_vm11 = vcmp.ge.f32.partialorder %v1438_v37, -2.2  ;;  %vm527_vm12 = vcmp.lt.f32.partialorder %v1438_v37, -1.8  ;;  %vm535_vm13 = vcmp.ge.f32.partialorder %v1438_v37, -1.8  ;;  %vm1445_vm15 = vmand %vm524_vm9, %vm526_vm10 }
 0x12d   : > { %vm529_vm0 = vmand %vm525_vm11, %vm527_vm12  ;;  %vm537_vm1 = vcmp.lt.f32.partialorder %v1438_v37, -1.4  ;;  %vm545_vm2 = vcmp.ge.f32.partialorder %v1438_v37, -1.4  ;;  %vm547_vm3 = vcmp.lt.f32.partialorder %v1438_v37, -1.0  ;;  %vm555_vm4 = vcmp.ge.f32.partialorder %v1438_v37, -1.0 }
 0x12e   : > { %v1152_v35 = vsel %vm529_vm0, 1.0, %v1226_v0  ;;  %vm539_vm5 = vmand %vm535_vm13, %vm537_vm1  ;;  %vm557_vm6 = vcmp.lt.f32.partialorder %v1438_v37, -0.6  ;;  %vm565_vm7 = vcmp.ge.f32.partialorder %v1438_v37, -0.6  ;;  %v655_v39 = vsub.f32 -1.0, %v1438_v37 }
 0x12f   : > { %vm549_vm8 = vmand %vm545_vm2, %vm547_vm3  ;;  %vm567_vm9 = vcmp.lt.f32.partialorder %v1438_v37, -0.20000002  ;;  %vm575_vm10 = vcmp.ge.f32.partialorder %v1438_v37, -0.20000002  ;;  %v1460_v40 = vadd.f32 1.0, %v1438_v37  ;;  %v1154_v42 = vsel %vm539_vm5, 1.0, %v1226_v0 }
 0x130   : > { %v1156_v46 = vsel %vm549_vm8, 1.0, %v1226_v0  ;;  %vm559_vm11 = vmand %vm555_vm4, %vm557_vm6  ;;  %vm577_vm12 = vcmp.lt.f32.partialorder %v1438_v37, 0.20000003  ;;  %vm585_vm13 = vcmp.ge.f32.partialorder %v1438_v37, 0.20000003  ;;  %v1474_v48 = vsel %vm1445_vm15, 1.0, %v1226_v0 }
 0x131   : > { %v1158_v14 = vsel %vm559_vm11, 1.0, %v1226_v0  ;;  %vm569_vm0 = vmand %vm565_vm7, %vm567_vm9  ;;  %vm587_vm1 = vcmp.lt.f32.partialorder %v1438_v37, 0.6  ;;  %v1469_v47 = vadd.f32 2.2, %v1438_v37  ;;  %v805_v52 = vmul.f32 1.25, %v1460_v40 }
 0x132   : > { %v1160_v49 = vsel %vm569_vm0, 1.0, %v1226_v0  ;;  %vm579_vm2 = vmand %vm575_vm10, %vm577_vm12  ;;  %v641_v50 = vsub.f32 -1.4, %v1438_v37  ;;  %v1479_v51 = vadd.f32 1.8, %v1438_v37  ;;  %v1488_v60 = vadd.f32 1.0, %v1436_v61 }
 0x133   : > { %v1162_v53 = vsel %vm579_vm2, 1.0, %v1226_v0  ;;  %vm589_vm3 = vmand %vm585_vm13, %vm587_vm1  ;;  %v637_v54 = vmul.f32 2.4999995, %v1469_v47  ;;  %v657_v55 = vmul.f32 2.5000002, %v655_v39  ;;  %vm546_vm15 = vcmp.lt.f32.partialorder %v1436_v61, -1.0 }
 0x134   : > { %v1164_v18 = vsel %vm589_vm3, 1.0, %v1226_v0  ;;  %v643_v58 = vmul.f32 2.5000002, %v641_v50  ;;  %v651_v59 = vmul.f32 2.5000002, %v1479_v51  ;;  %vm554_vm4 = vcmp.ge.f32.partialorder %v1436_v61, -1.0 }
 0x135   : > { %v639_v62 = vmul.f32 %v1152_v35, %v637_v54  ;;  %v659_v63 = vmul.f32 %v1156_v46, %v657_v55  ;;  %v1491_v9 = vadd.f32 1.4, %v1438_v37  ;;  %v669_v29 = vsub.f32 -0.6, %v1438_v37 }
 0x136   : > { %v645_v13 = vmul.f32 %v1154_v42, %v643_v58  ;;  %v653_v3 = vmul.f32 %v1154_v42, %v651_v59  ;;  %v679_v4 = vmul.f32 2.5000002, %v1460_v40  ;;  %v683_v6 = vsub.f32 -0.20000002, %v1438_v37 }
 0x137   : > { %v665_v32 = vmul.f32 2.5000002, %v1491_v9  ;;  %v671_v8 = vmul.f32 2.5000002, %v669_v29  ;;  %v1498_v12 = vadd.f32 0.6, %v1438_v37 }
 0x138   : > { %v647_v11 = vadd.f32 %v645_v13, %v639_v62  ;;  %v661_v26 = vadd.f32 %v659_v63, %v653_v3  ;;  %v681_v1 = vmul.f32 %v1158_v14, %v679_v4  ;;  %v685_v23 = vmul.f32 2.5, %v683_v6 }
 0x139   : > { %v667_v16 = vmul.f32 %v1156_v46, %v665_v32  ;;  %v673_v15 = vmul.f32 %v1158_v14, %v671_v8  ;;  %v693_v17 = vmul.f32 2.5, %v1498_v12  ;;  %v697_v41 = vsub.f32 0.20000003, %v1438_v37 }
 0x13a   : > { %v687_v20 = vmul.f32 %v1160_v49, %v685_v23  ;;  %v1503_v7 = vadd.f32 0.20000002, %v1438_v37  ;;  %v711_v21 = vsub.f32 0.6, %v1438_v37  ;;  %v1507_v24 = vadd.f32 -0.20000003, %v1438_v37 }
 0x13b   : > { %v675_v25 = vadd.f32 %v673_v15, %v667_v16  ;;  %v695_v22 = vmul.f32 %v1160_v49, %v693_v17  ;;  %v699_v27 = vmul.f32 2.4999998, %v697_v41  ;;  %v775_v44 = vmul.f32 1.2499999, %v1469_v47 }
 0x13c   : > { %v689_v33 = vadd.f32 %v687_v20, %v681_v1  ;;  %v707_v5 = vmul.f32 2.4999998, %v1503_v7  ;;  %v713_v31 = vmul.f32 2.5, %v711_v21  ;;  %v721_v45 = vmul.f32 2.5, %v1507_v24 }
 0x13d   : > { %v701_v28 = vmul.f32 %v1162_v53, %v699_v27  ;;  %v777_v30 = vmul.f32 %v775_v44, %v647_v11  ;;  %v779_v19 = vmul.f32 1.2500001, %v655_v39  ;;  %v785_v10 = vmul.f32 1.2500001, %v1479_v51 }
 0x13e   : > { %v709_v57 = vmul.f32 %v1162_v53, %v707_v5  ;;  %v715_v34 = vmul.f32 %v1164_v18, %v713_v31  ;;  %v1513_v36 = vmul.f32 %v1164_v18, %v721_v45  ;;  %v789_v43 = vmul.f32 1.2500001, %v669_v29 }
 0x13f   : > { %v703_v2 = vadd.f32 %v701_v28, %v695_v22  ;;  %v781_v38 = vmul.f32 %v779_v19, %v661_v26  ;;  %v787_v35 = vmul.f32 %v785_v10, %v661_v26  ;;  %v795_v42 = vmul.f32 1.2500001, %v1491_v9 }
 0x140   : > { %v1517_v46 = vadd.f32 %v715_v34, %v709_v57  ;;  %v791_v14 = vmul.f32 %v789_v43, %v675_v25  ;;  %v799_v49 = vmul.f32 1.25, %v683_v6  ;;  %v807_v50 = vmul.f32 %v805_v52, %v689_v33 }
 0x141   : > { %v783_v39 = vadd.f32 %v781_v38, %v777_v30  ;;  %v797_v53 = vmul.f32 %v795_v42, %v675_v25  ;;  %v809_v54 = vmul.f32 1.2499999, %v697_v41  ;;  %v815_v55 = vmul.f32 1.2499999, %v1498_v12 }
 0x142   : > { %v793_v18 = vadd.f32 %v791_v14, %v787_v35  ;;  %v801_v58 = vmul.f32 %v799_v49, %v689_v33  ;;  %v819_v59 = vmul.f32 1.2499999, %v711_v21  ;;  %v865_v62 = vmul.f32 0.8333333, %v1469_v47 }
 0x143   : > { %v811_v63 = vmul.f32 %v809_v54, %v703_v2  ;;  %v817_v13 = vmul.f32 %v815_v55, %v703_v2  ;;  %v869_v3 = vmul.f32 0.8333334, %v669_v29  ;;  %v875_v4 = vmul.f32 0.8333334, %v1479_v51 }
 0x144   : > { %v803_v32 = vadd.f32 %v801_v58, %v797_v53  ;;  %v821_v52 = vmul.f32 %v819_v59, %v1517_v46  ;;  %v867_v8 = vmul.f32 %v865_v62, %v783_v39  ;;  %v879_v11 = vmul.f32 0.8333334, %v683_v6 }
 0x145   : > { %v813_v26 = vadd.f32 %v811_v63, %v807_v50  ;;  %v871_v1 = vmul.f32 %v869_v3, %v793_v18  ;;  %v877_v23 = vmul.f32 %v875_v4, %v793_v18  ;;  %v885_v16 = vmul.f32 0.8333334, %v1491_v9 }
 0x146   : > { %v1525_v15 = vadd.f32 %v821_v52, %v817_v13  ;;  %v881_v17 = vmul.f32 %v879_v11, %v803_v32  ;;  %v889_v20 = vmul.f32 0.8333333, %v697_v41  ;;  %v895_v47 = vmul.f32 0.8333333, %v1460_v40 }
 0x147   : > { %v873_v25 = vadd.f32 %v871_v1, %v867_v8  ;;  %v887_v29 = vmul.f32 %v885_v16, %v803_v32  ;;  %v899_v22 = vmul.f32 0.8333333, %v711_v21  ;;  %vm534_vm5 = vcmp.ge.f32.partialorder %v1436_v61, -1.8 }
 0x148   : > { %v883_v51 = vadd.f32 %v881_v17, %v877_v23  ;;  %v891_v27 = vmul.f32 %v889_v20, %v813_v26  ;;  %v897_v44 = vmul.f32 %v895_v47, %v813_v26  ;;  %vm536_vm6 = vcmp.lt.f32.partialorder %v1436_v61, -1.4 }
 0x149   : > { %v901_v6 = vmul.f32 %v899_v22, %v1525_v15  ;;  %vm538_vm7 = vmand %vm534_vm5, %vm536_vm6  ;;  %vm544_vm8 = vcmp.ge.f32.partialorder %v1436_v61, -1.4  ;;  %vm556_vm9 = vcmp.lt.f32.partialorder %v1436_v61, -0.6  ;;  %vm564_vm10 = vcmp.ge.f32.partialorder %v1436_v61, -0.6 }
 0x14a   : > { %v893_v40 = vadd.f32 %v891_v27, %v887_v29  ;;  %v947_v9 = vrot.slane %v883_v51, 4  ;;  %v1153_v41 = vsel %vm538_vm7, 1.0, %v1226_v0  ;;  %vm548_vm11 = vmand %vm544_vm8, %vm546_vm15  ;;  %vm566_vm12 = vcmp.lt.f32.partialorder %v1436_v61, -0.20000002 }
 0x14b   : > { %v903_v21 = vadd.f32 %v901_v6, %v897_v44  ;;  %v1155_v33 = vsel %vm548_vm11, 1.0, %v1226_v0  ;;  %vm558_vm13 = vmand %vm554_vm4, %vm556_vm9  ;;  %vm574_vm0 = vcmp.ge.f32.partialorder %v1436_v61, -0.20000002  ;;  %vm576_vm1 = vcmp.lt.f32.partialorder %v1436_v61, 0.20000003 }
 0x14c   : > { %v969_v5 = vsel %vm436_vm14, %v873_v25, %v947_v9  ;;  %v1157_v31 = vsel %vm558_vm13, 1.0, %v1226_v0  ;;  %vm568_vm2 = vmand %vm564_vm10, %vm566_vm12  ;;  %vm584_vm3 = vcmp.ge.f32.partialorder %v1436_v61, 0.20000003  ;;  %vm586_vm15 = vcmp.lt.f32.partialorder %v1436_v61, 0.6 }
 0x14d   : > { %v953_v45 = vrot.slane %v903_v21, 4  ;;  %v1159_v28 = vsel %vm568_vm2, 1.0, %v1226_v0  ;;  %vm578_vm5 = vmand %vm574_vm0, %vm576_vm1  ;;  %v1549_v30 = vadd.f32 2.2, %v1436_v61  ;;  %v640_v19 = vsub.f32 -1.4, %v1436_v61 }
 0x14e   : > { %v1161_v10 = vsel %vm578_vm5, 1.0, %v1226_v0  ;;  %vm588_vm4 = vmand %vm584_vm3, %vm586_vm15  ;;  %v1554_v57 = vadd.f32 1.8, %v1436_v61  ;;  %v656_v34 = vmul.f32 2.5000002, %v654_v56  ;;  %v804_v43 = vmul.f32 1.25, %v1488_v60 }
 0x14f   : > { %v971_v2 = vsel %vm436_vm14, %v893_v40, %v953_v45  ;;  %v1561_v38 = vsel %vm588_vm4, 1.0, %v1226_v0  ;;  %v636_v35 = vmul.f32 2.4999995, %v1549_v30  ;;  %v642_v42 = vmul.f32 2.5000002, %v640_v19 }
 0x150   : > { %v1201_v14 = vpack.c.bf16 %v971_v2, %v969_v5  ;;  %v650_v49 = vmul.f32 2.5000002, %v1554_v57  ;;  %v658_v50 = vmul.f32 %v1155_v33, %v656_v34  ;;  %v1566_v39 = vadd.f32 1.4, %v1436_v61 }
 0x151   : > { %v638_v53 = vmul.f32 %v1474_v48, %v636_v35  ;;  %v644_v54 = vmul.f32 %v1153_v41, %v642_v42  ;;  %v668_v55 = vsub.f32 -0.6, %v1436_v61  ;;  %v678_v18 = vmul.f32 2.5000002, %v1488_v60 }
 0x152   : > { %1202 = vmatprep.subr.bf16.mxu1 %v1201_v14  ;;  %v652_v58 = vmul.f32 %v1153_v41, %v650_v49  ;;  %v664_v59 = vmul.f32 2.5000002, %v1566_v39  ;;  %v682_v62 = vsub.f32 -0.20000002, %v1436_v61  ;;  %v1574_v63 = vadd.f32 0.6, %v1436_v61 }
 0x153   : > { %v646_v13 = vadd.f32 %v644_v54, %v638_v53  ;;  %v670_v3 = vmul.f32 2.5000002, %v668_v55  ;;  %v680_v4 = vmul.f32 %v1157_v31, %v678_v18  ;;  %v696_v32 = vsub.f32 0.20000003, %v1436_v61 }
 0x154   : > { %v660_v48 = vadd.f32 %v658_v50, %v652_v58  ;;  %v666_v52 = vmul.f32 %v1155_v33, %v664_v59  ;;  %v684_v8 = vmul.f32 2.5, %v682_v62  ;;  %v692_v11 = vmul.f32 2.5, %v1574_v63 }
 0x155   : > { %v672_v26 = vmul.f32 %v1157_v31, %v670_v3  ;;  %v698_v1 = vmul.f32 2.4999998, %v696_v32  ;;  %v1579_v23 = vadd.f32 0.20000002, %v1436_v61  ;;  %v710_v16 = vsub.f32 0.6, %v1436_v61 }
 0x156   : > { %v686_v17 = vmul.f32 %v1159_v28, %v684_v8  ;;  %v694_v20 = vmul.f32 %v1159_v28, %v692_v11  ;;  %v774_v47 = vmul.f32 1.2499999, %v1549_v30  ;;  %v778_v25 = vmul.f32 1.2500001, %v654_v56 }
 0x157   : > { %v674_v29 = vadd.f32 %v672_v26, %v666_v52  ;;  %v700_v22 = vmul.f32 %v1161_v10, %v698_v1  ;;  %v706_v51 = vmul.f32 2.4999998, %v1579_v23  ;;  %v712_v27 = vmul.f32 2.5, %v710_v16 }
 0x158   : > { %v688_v44 = vadd.f32 %v686_v17, %v680_v4  ;;  %v776_v6 = vmul.f32 %v774_v47, %v646_v13  ;;  %v780_v40 = vmul.f32 %v778_v25, %v660_v48  ;;  %v784_v9 = vmul.f32 1.2500001, %v1554_v57 }
 0x159   : > { %v702_v41 = vadd.f32 %v700_v22, %v694_v20  ;;  %v708_v21 = vmul.f32 %v1161_v10, %v706_v51  ;;  %v714_v33 = vmul.f32 %v1561_v38, %v712_v27  ;;  %v788_v5 = vmul.f32 1.2500001, %v668_v55 }
 0x15a   : > { %v782_v31 = vadd.f32 %v780_v40, %v776_v6  ;;  %v786_v45 = vmul.f32 %v784_v9, %v660_v48  ;;  %v794_v28 = vmul.f32 1.2500001, %v1566_v39  ;;  %v798_v56 = vmul.f32 1.25, %v682_v62 }
 0x15b   : > { %v1589_v19 = vadd.f32 %v714_v33, %v708_v21  ;;  %v790_v34 = vmul.f32 %v788_v5, %v674_v29  ;;  %v806_v2 = vmul.f32 %v804_v43, %v688_v44  ;;  %v808_v35 = vmul.f32 1.2499999, %v696_v32 }
 0x15c   : > { %v796_v42 = vmul.f32 %v794_v28, %v674_v29  ;;  %v800_v14 = vmul.f32 %v798_v56, %v688_v44  ;;  %v814_v49 = vmul.f32 1.2499999, %v1574_v63  ;;  %v818_v50 = vmul.f32 1.2499999, %v710_v16 }
 0x15d   : > { %v792_v53 = vadd.f32 %v790_v34, %v786_v45  ;;  %v810_v10 = vmul.f32 %v808_v35, %v702_v41  ;;  %v864_v54 = vmul.f32 0.8333333, %v1549_v30  ;;  %v868_v18 = vmul.f32 0.8333334, %v668_v55 }
 0x15e   : > { %v802_v58 = vadd.f32 %v800_v14, %v796_v42  ;;  %v816_v59 = vmul.f32 %v814_v49, %v702_v41  ;;  %v820_v13 = vmul.f32 %v818_v50, %v1589_v19  ;;  %v874_v3 = vmul.f32 0.8333334, %v1554_v57 }
 0x15f   : > { %v812_v4 = vadd.f32 %v810_v10, %v806_v2  ;;  %v866_v48 = vmul.f32 %v864_v54, %v782_v31  ;;  %v870_v43 = vmul.f32 %v868_v18, %v792_v53  ;;  %v878_v52 = vmul.f32 0.8333334, %v682_v62 }
 0x160   : > { %v1595_v8 = vadd.f32 %v820_v13, %v816_v59  ;;  %v876_v11 = vmul.f32 %v874_v3, %v792_v53  ;;  %v884_v26 = vmul.f32 0.8333334, %v1566_v39  ;;  %v888_v1 = vmul.f32 0.8333333, %v696_v32 }
 0x161   : > { %v872_v17 = vadd.f32 %v870_v43, %v866_v48  ;;  %v880_v20 = vmul.f32 %v878_v52, %v802_v58  ;;  %v894_v30 = vmul.f32 0.8333333, %v1488_v60  ;;  %v898_v55 = vmul.f32 0.8333333, %v710_v16 }
 0x162   : > { %v886_v47 = vmul.f32 %v884_v26, %v802_v58  ;;  %v890_v25 = vmul.f32 %v888_v1, %v812_v4  ;;  %vm595_vm6 = vcmp.ge.f32.partialorder %v1438_v37, 0.6  ;;  %vm597_vm7 = vcmp.lt.f32.partialorder %v1438_v37, 1.0 }
 0x163   : > { %v882_v57 = vadd.f32 %v880_v20, %v876_v11  ;;  %v896_v29 = vmul.f32 %v894_v30, %v812_v4  ;;  %v900_v62 = vmul.f32 %v898_v55, %v1595_v8  ;;  %vm599_vm8 = vmand %vm595_vm6, %vm597_vm7  ;;  %vm605_vm9 = vcmp.ge.f32.partialorder %v1438_v37, 1.0 }
 0x164   : > { %v892_v39 = vadd.f32 %v890_v25, %v886_v47  ;;  %v1166_v32 = vsel %vm599_vm8, 1.0, %v1226_v0  ;;  %vm607_vm10 = vcmp.lt.f32.partialorder %v1438_v37, 1.4  ;;  %vm615_vm11 = vcmp.ge.f32.partialorder %v1438_v37, 1.4 }
 0x165   : > { %v902_v60 = vadd.f32 %v900_v62, %v896_v29  ;;  %v946_v16 = vrot.slane %v882_v57, 4  ;;  %vm609_vm12 = vmand %vm605_vm9, %vm607_vm10  ;;  %vm617_vm13 = vcmp.lt.f32.partialorder %v1438_v37, 1.8  ;;  %vm625_vm0 = vcmp.ge.f32.partialorder %v1438_v37, 1.8 }
 0x166   : > { %v1168_v22 = vsel %vm609_vm12, 1.0, %v1226_v0  ;;  %vm619_vm1 = vmand %vm615_vm11, %vm617_vm13  ;;  %vm627_vm2 = vcmp.lt.f32.partialorder %v1438_v37, 2.2  ;;  %v725_v51 = vsub.f32 1.0, %v1438_v37  ;;  %v1188_v27 = vadd.f32 -0.6, %v1438_v37 }
 0x167   : > { %v952_v44 = vrot.slane %v902_v60, 4  ;;  %v968_v6 = vsel %vm436_vm14, %v872_v17, %v946_v16  ;;  %v1170_v40 = vsel %vm619_vm1, 1.0, %v1226_v0  ;;  %vm629_vm3 = vmand %vm625_vm0, %vm627_vm2  ;;  %v739_v9 = vsub.f32 1.4, %v1438_v37 }
 0x168   : > { %v1172_v41 = vsel %vm629_vm3, 1.0, %v1226_v0  ;;  %v727_v21 = vmul.f32 2.5000002, %v725_v51  ;;  %v735_v33 = vmul.f32 2.5000002, %v1188_v27  ;;  %v1190_v5 = vadd.f32 -1.0, %v1438_v37 }
 0x169   : > { %v970_v31 = vsel %vm436_vm14, %v892_v39, %v952_v44  ;;  %v741_v45 = vmul.f32 2.5000002, %v739_v9  ;;  %v753_v28 = vsub.f32 1.8, %v1438_v37  ;;  %v1192_v56 = vadd.f32 -1.4, %v1438_v37 }
 0x16a   : > { %v1203_v34 = vpack.c.bf16 %v970_v31, %v968_v6  ;;  %v729_v2 = vmul.f32 %v1166_v32, %v727_v21  ;;  %v737_v35 = vmul.f32 %v1166_v32, %v735_v33  ;;  %v749_v42 = vmul.f32 2.5000002, %v1190_v5 }
 0x16b   : > { %v743_v14 = vmul.f32 %v1168_v22, %v741_v45  ;;  %v755_v49 = vmul.f32 2.5000002, %v753_v28  ;;  %v763_v50 = vmul.f32 2.5000002, %v1192_v56  ;;  %v767_v53 = vsub.f32 2.2, %v1438_v37 }
 0x16c   : > { %1204 = vmatpush1.bf16.msra.mxu1 %v1203_v34  ;;  %v731_v10 = vadd.f32 %v729_v2, %v1513_v36  ;;  %v751_v54 = vmul.f32 %v1168_v22, %v749_v42  ;;  %v825_v18 = vmul.f32 1.2499999, %v1503_v7  ;;  %v829_v58 = vmul.f32 1.25, %v725_v51 }
 0x16d   : > { %v745_v59 = vadd.f32 %v743_v14, %v737_v35  ;;  %v757_v13 = vmul.f32 %v1170_v40, %v755_v49  ;;  %v765_v3 = vmul.f32 %v1170_v40, %v763_v50  ;;  %v769_v4 = vmul.f32 2.4999995, %v767_v53 }
 0x16e   : > { %v827_v48 = vmul.f32 %v825_v18, %v1517_v46  ;;  %v831_v43 = vmul.f32 %v829_v58, %v731_v10  ;;  %v835_v52 = vmul.f32 1.25, %v1507_v24  ;;  %v839_v11 = vmul.f32 1.2500001, %v739_v9 }
 0x16f   : > { %v759_v26 = vadd.f32 %v757_v13, %v751_v54  ;;  %v771_v1 = vmul.f32 %v1172_v41, %v769_v4  ;;  %v845_v37 = vmul.f32 1.2500001, %v1188_v27  ;;  %v849_v17 = vmul.f32 1.2500001, %v753_v28 }
 0x170   : > { %v833_v20 = vadd.f32 %v831_v43, %v827_v48  ;;  %v837_v36 = vmul.f32 %v835_v52, %v731_v10  ;;  %v841_v30 = vmul.f32 %v839_v11, %v745_v59  ;;  %v855_v55 = vmul.f32 1.2500001, %v1190_v5 }
 0x171   : > { %v773_v47 = vadd.f32 %v771_v1, %v765_v3  ;;  %v847_v25 = vmul.f32 %v845_v37, %v745_v59  ;;  %v851_v57 = vmul.f32 %v849_v17, %v759_v26  ;;  %v859_v29 = vmul.f32 1.2499999, %v767_v53 }
 0x172   : > { %v843_v62 = vadd.f32 %v841_v30, %v837_v36  ;;  %v857_v39 = vmul.f32 %v855_v55, %v759_v26  ;;  %v905_v46 = vmul.f32 0.8333333, %v1498_v12  ;;  %v909_v32 = vmul.f32 0.8333333, %v725_v51 }
 0x173   : > { %v853_v60 = vadd.f32 %v851_v57, %v847_v25  ;;  %v861_v16 = vmul.f32 %v859_v29, %v773_v47  ;;  %v915_v22 = vmul.f32 0.8333333, %v1503_v7  ;;  %v919_v44 = vmul.f32 0.8333334, %v739_v9 }
 0x174   : > { %v907_v6 = vmul.f32 %v905_v46, %v1525_v15  ;;  %v911_v40 = vmul.f32 %v909_v32, %v833_v20  ;;  %v925_v41 = vmul.f32 0.8333334, %v1507_v24  ;;  %v929_v21 = vmul.f32 0.8333334, %v753_v28 }
 0x175   : > { %v863_v33 = vadd.f32 %v861_v16, %v857_v39  ;;  %v917_v5 = vmul.f32 %v915_v22, %v833_v20  ;;  %v921_v31 = vmul.f32 %v919_v44, %v843_v62  ;;  %v935_v45 = vmul.f32 0.8333334, %v1188_v27 }
 0x176   : > { %v913_v56 = vadd.f32 %v911_v40, %v907_v6  ;;  %v927_v34 = vmul.f32 %v925_v41, %v843_v62  ;;  %v931_v2 = vmul.f32 %v929_v21, %v853_v60  ;;  %v939_v12 = vmul.f32 0.8333333, %v767_v53 }
 0x177   : > { %v923_v51 = vadd.f32 %v921_v31, %v917_v5  ;;  %v937_v35 = vmul.f32 %v935_v45, %v853_v60  ;;  %vm594_vm15 = vcmp.ge.f32.partialorder %v1436_v61, 0.6  ;;  %vm596_vm5 = vcmp.lt.f32.partialorder %v1436_v61, 1.0 }
 0x178   : > { %v933_v7 = vadd.f32 %v931_v2, %v927_v34  ;;  %v941_v15 = vmul.f32 %v939_v12, %v863_v33  ;;  %vm598_vm4 = vmand %vm594_vm15, %vm596_vm5  ;;  %vm604_vm6 = vcmp.ge.f32.partialorder %v1436_v61, 1.0  ;;  %vm606_vm7 = vcmp.lt.f32.partialorder %v1436_v61, 1.4 }
 0x179   : > { %v959_v24 = vrot.slane %v923_v51, 4  ;;  %v1165_v27 = vsel %vm598_vm4, 1.0, %v1226_v0  ;;  %vm608_vm8 = vmand %vm604_vm6, %vm606_vm7  ;;  %vm614_vm9 = vcmp.ge.f32.partialorder %v1436_v61, 1.4  ;;  %vm616_vm10 = vcmp.lt.f32.partialorder %v1436_v61, 1.8 }
 0x17a   : > { %v943_v9 = vadd.f32 %v941_v15, %v937_v35  ;;  %v1167_v28 = vsel %vm608_vm8, 1.0, %v1226_v0  ;;  %vm618_vm11 = vmand %vm614_vm9, %vm616_vm10  ;;  %vm624_vm12 = vcmp.ge.f32.partialorder %v1436_v61, 1.8  ;;  %vm626_vm13 = vcmp.lt.f32.partialorder %v1436_v61, 2.2 }
 0x17b   : > { %v973_v42 = vsel %vm436_vm14, %v913_v56, %v959_v24  ;;  %v1169_v14 = vsel %vm618_vm11, 1.0, %v1226_v0  ;;  %vm628_vm0 = vmand %vm624_vm12, %vm626_vm13  ;;  %v1185_v49 = vadd.f32 -0.20000003, %v1436_v61  ;;  %v724_v50 = vsub.f32 1.0, %v1436_v61 }
 0x17c   : > { %v965_v53 = vrot.slane %v943_v9, 4  ;;  %v1171_v10 = vsel %vm628_vm0, 1.0, %v1226_v0  ;;  %v1187_v54 = vadd.f32 -0.6, %v1436_v61  ;;  %v738_v18 = vsub.f32 1.4, %v1436_v61 }
 0x17d   : > { %v720_v58 = vmul.f32 2.5, %v1185_v49  ;;  %v726_v59 = vmul.f32 2.5000002, %v724_v50  ;;  %v1189_v13 = vadd.f32 -1.0, %v1436_v61  ;;  %v752_v3 = vsub.f32 1.8, %v1436_v61 }
 0x17e   : > { %v975_v4 = vsel %vm436_vm14, %v933_v7, %v965_v53  ;;  %v734_v48 = vmul.f32 2.5000002, %v1187_v54  ;;  %v740_v43 = vmul.f32 2.5000002, %v738_v18  ;;  %v1191_v52 = vadd.f32 -1.4, %v1436_v61 }
 0x17f   : > { %v1205_v11 = vpack.c.bf16 %v975_v4, %v973_v42  ;;  %v722_v26 = vmul.f32 %v1561_v38, %v720_v58  ;;  %v728_v0 = vmul.f32 %v1165_v27, %v726_v59  ;;  %v748_v1 = vmul.f32 2.5000002, %v1189_v13 }
 0x180   : > { %v736_v37 = vmul.f32 %v1165_v27, %v734_v48  ;;  %v742_v17 = vmul.f32 %v1167_v28, %v740_v43  ;;  %v754_v20 = vmul.f32 2.5000002, %v752_v3  ;;  %v762_v36 = vmul.f32 2.5000002, %v1191_v52 }
 0x181   : > { %1206 = vmatprep.subr.bf16.mxu1 %v1205_v11  ;;  %v730_v30 = vadd.f32 %v728_v0, %v722_v26  ;;  %v750_v55 = vmul.f32 %v1167_v28, %v748_v1  ;;  %v766_v47 = vsub.f32 2.2, %v1436_v61  ;;  %v824_v25 = vmul.f32 1.2499999, %v1579_v23 }
 0x182   : > { %v744_v57 = vadd.f32 %v742_v17, %v736_v37  ;;  %v756_v29 = vmul.f32 %v1169_v14, %v754_v20  ;;  %v764_v62 = vmul.f32 %v1169_v14, %v762_v36  ;;  %v828_v39 = vmul.f32 1.25, %v724_v50 }
 0x183   : > { %v768_v46 = vmul.f32 2.4999995, %v766_v47  ;;  %v826_v38 = vmul.f32 %v824_v25, %v1589_v19  ;;  %v834_v32 = vmul.f32 1.25, %v1185_v49  ;;  %v838_v60 = vmul.f32 1.2500001, %v738_v18 }
 0x184   : > { %v758_v16 = vadd.f32 %v756_v29, %v750_v55  ;;  %v830_v22 = vmul.f32 %v828_v39, %v730_v30  ;;  %v844_v44 = vmul.f32 1.2500001, %v1187_v54  ;;  %v848_v6 = vmul.f32 1.2500001, %v752_v3 }
 0x185   : > { %v770_v40 = vmul.f32 %v1171_v10, %v768_v46  ;;  %v836_v41 = vmul.f32 %v834_v32, %v730_v30  ;;  %v840_v21 = vmul.f32 %v838_v60, %v744_v57  ;;  %v854_v33 = vmul.f32 1.2500001, %v1189_v13 }
 0x186   : > { %v832_v61 = vadd.f32 %v830_v22, %v826_v38  ;;  %v846_v5 = vmul.f32 %v844_v44, %v744_v57  ;;  %v850_v31 = vmul.f32 %v848_v6, %v758_v16  ;;  %v858_v45 = vmul.f32 1.2499999, %v766_v47 }
 0x187   : > { %v772_v56 = vadd.f32 %v770_v40, %v764_v62  ;;  %v842_v34 = vadd.f32 %v840_v21, %v836_v41  ;;  %v856_v2 = vmul.f32 %v854_v33, %v758_v16  ;;  %v904_v12 = vmul.f32 0.8333333, %v1574_v63 }
 0x188   : > { %v852_v19 = vadd.f32 %v850_v31, %v846_v5  ;;  %v914_v51 = vmul.f32 0.8333333, %v1579_v23  ;;  %v918_v35 = vmul.f32 0.8333334, %v738_v18  ;;  %v908_v24 = vmul.f32 0.8333333, %v724_v50 }
 0x189   : > { %v860_v7 = vmul.f32 %v858_v45, %v772_v56  ;;  %v906_v15 = vmul.f32 %v904_v12, %v1595_v8  ;;  %v924_v28 = vmul.f32 0.8333334, %v1185_v49  ;;  %v934_v42 = vmul.f32 0.8333334, %v1187_v54 }
 0x18a   : > { %v916_v27 = vmul.f32 %v914_v51, %v832_v61  ;;  %v920_v9 = vmul.f32 %v918_v35, %v842_v34  ;;  %v910_v53 = vmul.f32 %v908_v24, %v832_v61  ;;  %v928_v10 = vmul.f32 0.8333334, %v752_v3  ;;  %v976_v3 = vld [vmem:[%s1671_s2] sm:$0x3] }
 0x18b   : > { %v862_v14 = vadd.f32 %v860_v7, %v856_v2  ;;  %v938_v58 = vmul.f32 0.8333333, %v766_v47  ;;  %v936_v13 = vmul.f32 %v934_v42, %v852_v19  ;;  %v926_v63 = vmul.f32 %v924_v28, %v842_v34 }
 0x18c   : > { %v922_v59 = vadd.f32 %v920_v9, %v916_v27  ;;  %v930_v4 = vmul.f32 %v928_v10, %v852_v19  ;;  %v912_v18 = vadd.f32 %v910_v53, %v906_v15  ;;  %vm977_vm1 = vcmask 261120  }
 0x18d   : > { %v940_v48 = vmul.f32 %v938_v58, %v862_v14 }
 0x18e   : > { %v958_v23 = vrot.slane %v922_v59, 4  ;;  %v932_v52 = vadd.f32 %v930_v4, %v926_v63 }
 0x18f   : > { %v942_v43 = vadd.f32 %v940_v48, %v936_v13 }
 0x190   : > { %v972_v50 = vsel %vm436_vm14, %v912_v18, %v958_v23 }
 0x191   : > { %v964_v8 = vrot.slane %v942_v43, 4 }
 0x193   : > { %v974_v49 = vsel %vm436_vm14, %v932_v52, %v964_v8 }
 0x194   : > { %v1207_v54 = vpack.c.bf16 %v974_v49, %v972_v50 }
 0x196   : > { %1208 = vmatpush1.bf16.msra.mxu1 %v1207_v54 }
 0x199   : > { %1193 = vmatmul.mubr.msk.f32.vlgmr.msra.gmra.mrb[0].mxu1 %vm977_vm1, %v976_v3 }
 0x26c   : > { %v1047_v11 = vpop.f32.mrb[0].mxu1 }
 0x26d   : > { %v1049_v26 = vpop.f32.mrb[1].mxu1 }
 0x26e   : > { %v1054_v0 = vcombine.low %v1047_v11, %v1049_v26 }
 0x270   : > { %1194 = vst.sshfl [vmem:[%s172_s26] sm:$0x33 pattern:$0x76325410] %v1054_v0 }
 0x271 PF: > { %s13_s12 = sadd.s32 1, %s1224_s12  }
 0x272   : > { %p10_p4 = scmp.ge.s32.totalorder %s13_s12, 4  }
 0x274   :  { %12 = sbr.rel (!%p10_p4) target bundleno = 1 (0x1), region = 62 }

</bundles_post_ra>
